<compile_context>
chip_gen: v6e
topology: v6e:2x2x1
jax: 0.10.0
libtpu: 0.0.40
codegen_flags: <defaults>
</compile_context>

<pallas_src>
import functools

import numpy as np
import jax
import jax.numpy as jnp
from jax.experimental import pallas as pl
from jax.experimental.pallas import tpu as pltpu


# ------------------------- bf16 weight-slab row layout -----------------------

_W1_OFF, _W1_ROWS = 0, 32        # conv1 GEMM weight, K 27->32, Cout 64->128
_S2_OFF, _S2_ROWS = 32, 288      # conv2 row-gather 0/1 selection (9 taps x 32)
_W2_OFF, _W2_ROWS = 320, 1152    # conv2 per-tap weights (9 x (Cin 128, Cout 128))
_WF1_OFF, _WF1_ROWS = 1472, 384  # fc1 weight with x.view(-1,320) folded (3 groups)
_WF2_OFF, _WF2_ROWS = 1856, 64   # fc2 weight (50->64 rows, class_num->128 lanes)
_SLAB_ROWS = 1920


# ------------------------------ Pallas kernel -------------------------------

def _sphereface_fused_kernel(p1_ref, w_ref, b_ref, o_ref):
    f32, bf16 = jnp.float32, jnp.bfloat16

    # f32 bias slab rows: 0=conv1, 1=conv2, 2=fc1 (50 real), 3=fc2 (+ -1e30 on
    # padded class lanes so they vanish from the softmax).
    b1 = b_ref[0:1, :]
    b2 = b_ref[1:2, :]
    b1f = b_ref[2:3, 0:64]
    b2f = b_ref[3:4, :]

    # ---- conv1 --------------------------------------------------------------
    # One (512,32)@(32,128) bf16 GEMM over all four pool quadrants (rows are
    # quadrant-major, (n,hp,wp) within a quadrant); the 2x2 maxpool is a max of
    # four 128-row slices; bias + relu epilogue in f32.
    w1 = w_ref[_W1_OFF:_W1_OFF + _W1_ROWS, :]
    g = jnp.dot(p1_ref[...], w1, preferred_element_type=f32)            # (512,128)
    pooled = jnp.maximum(jnp.maximum(g[0:128], g[128:256]),
                         jnp.maximum(g[256:384], g[384:512]))
    a1 = jnp.maximum(pooled + b1, 0.0).astype(bf16)                      # (128,128)

    # ---- conv2 --------------------------------------------------------------
    # im2col on the MXU: one batched 0/1-selection GEMM gathers, for all 9 taps
    # at once, the a1 rows (n, 2*ho+i, 2*wo+j) feeding conv2 output (n, ho, wo).
    # Rows are tap-major; within a tap, row = (ho*2+wo)*8 + n, so the 2x2
    # maxpool of conv2 is an elementwise max of four aligned 8-row blocks.
    s2 = w_ref[_S2_OFF:_S2_OFF + _S2_ROWS, :]
    patches = jnp.dot(s2, a1, preferred_element_type=f32).astype(bf16)   # (288,128)
    acc2 = jnp.zeros((32, 128), f32)
    for t in range(9):                               # running acc (MRB-friendly)
        w2t = w_ref[_W2_OFF + 128 * t:_W2_OFF + 128 * (t + 1), :]
        acc2 = acc2 + jnp.dot(patches[32 * t:32 * (t + 1), :], w2t,
                              preferred_element_type=f32)                # (32,128)
    acc2 = acc2 + b2
    # Rows n=5..7 of each 8-row block are relu(b2) padding (their selection rows
    # are all-zero); the fc head below only ever reads rows 0..4.
    a2 = jnp.maximum(jnp.maximum(jnp.maximum(acc2[0:8], acc2[8:16]),
                                 jnp.maximum(acc2[16:24], acc2[24:32])), 0.0)
    a2 = a2.astype(bf16)                    # (8,128): rows 0..4 = per-sample act

    # ---- fc1 -> relu -> fc2 -> log_softmax ----------------------------------
    # x.view(-1, 320) is folded into the repacked fc1 weight: lane-group j holds
    # two 64-lane blocks, one per (fc-row, sample) pair (the two 64-chunks of a
    # pair were merged offline), so fc1 is 3 GEMMs + 6 lane-slice adds instead
    # of ten M=1 GEMMs.  Block order is asserted in pack_params.
    p = []
    for j in range(3):
        wf = w_ref[_WF1_OFF + 128 * j:_WF1_OFF + 128 * (j + 1), :]
        p.append(jnp.dot(a2, wf, preferred_element_type=f32))            # (8,128)
    h0 = p[0][0:1, 0:64] + p[0][1:2, 64:128] + p[1][2:3, 0:64]
    h1 = p[1][2:3, 64:128] + p[2][3:4, 0:64] + p[2][4:5, 64:128]
    h = jnp.maximum(jnp.concatenate([h0, h1], axis=0) + b1f, 0.0)        # (2,64)
    # TODO(synk): F.dropout between fc1 and fc2 is identity (eval mode).
    w2f = w_ref[_WF2_OFF:_WF2_OFF + _WF2_ROWS, :]
    logits = jnp.dot(h.astype(bf16), w2f, preferred_element_type=f32) + b2f
    m = jnp.max(logits, axis=-1, keepdims=True)
    s = logits - m
    lse = jnp.log(jnp.sum(jnp.exp(s), axis=-1, keepdims=True))
    o_ref[...] = s - lse                                                 # (2,128)


# ----------------------- one-time parameter repacking ------------------------

def pack_params(params, class_num):
    """Repack PyTorch-layout params into one bf16 weight slab, one f32 bias
    slab and the conv1 im2col gather index table (all (8,128)-aligned)."""
    assert class_num <= 128
    w1c, b1c = [np.asarray(t, np.float32) for t in params["conv1"]]  # (64,3,3,3),(64,)
    w2c, b2c = [np.asarray(t, np.float32) for t in params["conv2"]]  # (128,64,3,3),(128,)
    w1f, b1f = [np.asarray(t, np.float32) for t in params["fc1"]]    # (320,50),(50,)
    w2f, b2f = [np.asarray(t, np.float32) for t in params["fc2"]]    # (50,C),(C,)

    # conv1 GEMM weight: K = (cin,kh,kw) 27->32 rows, Cout 64->128 lanes.
    w1g = np.zeros((_W1_ROWS, 128), np.float32)
    w1g[:27, :64] = w1c.reshape(64, 27).T

    # conv2 row-gather selection (exact 0/1, stored bf16): tap t=(i,j),
    # row = t*32 + (ho*2+wo)*8 + n, col = a1 row n*25 + (2*ho+i)*5 + (2*wo+j).
    s2 = np.zeros((_S2_ROWS, 128), np.float32)
    for i in range(3):
        for j in range(3):
            for ho in range(2):
                for wo in range(2):
                    for n in range(5):
                        row = (i * 3 + j) * 32 + (ho * 2 + wo) * 8 + n
                        col = n * 25 + (2 * ho + i) * 5 + (2 * wo + j)
                        s2[row, col] = 1.0

    # conv2 per-tap weights: tap-major rows, (Cin 64->128, Cout 128).
    w2g = np.zeros((_W2_ROWS, 128), np.float32)
    w2t = np.transpose(w2c, (2, 3, 1, 0)).reshape(9, 64, 128)   # (tap, cin, cout)
    for t in range(9):
        w2g[t * 128:t * 128 + 64, :] = w2t[t]

    # fc1 with x.view(-1, 320) folded in.  Chunk q (q-th 64-wide slice of the
    # flat 5*128 activation) comes from sample q//2, channel half q%2, pairs
    # with fc1 weight rows [64*(q%5), +64) and feeds fc row q//5.  Chunks that
    # share (fc row, sample) are merged into one 64-lane block; blocks are laid
    # out two per 128-lane group, in first-use order.
    wfc1 = np.zeros((_WF1_ROWS, 128), np.float32)
    block_of, order = {}, []
    for q in range(10):
        key = (q // 5, q // 2)                       # (fc row, sample)
        if key not in block_of:
            block_of[key] = len(order)
            order.append(key)
        b = block_of[key]
        grp, lane_half, chan_half = b // 2, b % 2, q % 2
        wfc1[grp * 128 + 64 * chan_half: grp * 128 + 64 * chan_half + 64,
             64 * lane_half: 64 * lane_half + 50] = \
            w1f[64 * (q % 5):64 * (q % 5) + 64, :]
    # The kernel's h0/h1 assembly hard-codes this block order.
    assert order == [(0, 0), (0, 1), (0, 2), (1, 2), (1, 3), (1, 4)], order

    # fc2: 50->64 rows, class_num->128 lanes.
    wfc2 = np.zeros((_WF2_ROWS, 128), np.float32)
    wfc2[:50, :class_num] = w2f

    wslab = np.concatenate([w1g, s2, w2g, wfc1, wfc2], axis=0)
    assert wslab.shape == (_SLAB_ROWS, 128)

    bslab = np.zeros((8, 128), np.float32)
    bslab[0, :64] = b1c
    bslab[1, :] = b2c
    bslab[2, :50] = b1f
    bslab[3, :class_num] = b2f
    bslab[3, class_num:] = -1e30        # padded class lanes vanish from softmax

    # conv1 im2col gather table: patch row = quad*128 + n*25 + hp*5 + wp
    # (quad = dh*2+dw pool quadrant), col = cin*9 + kh*3 + kw; value is a flat
    # index into x.reshape(-1).  Pad rows/cols point at element 0; their
    # contribution is killed by zero weight rows / never-selected a1 rows.
    idx = np.zeros((512, 32), np.int32)
    for dh in range(2):
        for dw in range(2):
            for n in range(5):
                for hp in range(5):
                    for wp in range(5):
                        row = (dh * 2 + dw) * 128 + n * 25 + hp * 5 + wp
                        for cin in range(3):
                            for kh in range(3):
                                for kw in range(3):
                                    h = 4 * hp + 2 * dh + kh
                                    w = 4 * wp + 2 * dw + kw
                                    idx[row, cin * 9 + kh * 3 + kw] = (
                                        ((n * 3 + cin) * 21 + h) * 21 + w)

    return dict(idx=jnp.asarray(idx),
                wslab=jnp.asarray(wslab, jnp.bfloat16),
                bslab=jnp.asarray(bslab, jnp.float32))


# -------------------------------- forward -----------------------------------

@functools.partial(jax.jit, static_argnames=("class_num",))
def sphereface_forward(packed, x, *, class_num):
    assert x.shape == (5, 3, 21, 21), (
        "fused kernel is specialized to the (5, 3, 21, 21) pipeline implied by "
        "the reference forward's x.view(-1, 320)")
    # Single-gather prologue: conv1 pool-quadrant-major im2col patches (bf16).
    p1 = jnp.take(x.reshape(-1), packed["idx"], axis=0).astype(jnp.bfloat16)
    vmem = pl.BlockSpec(memory_space=pltpu.MemorySpace.VMEM)
    out = pl.pallas_call(
        _sphereface_fused_kernel,
        out_shape=jax.ShapeDtypeStruct((2, 128), jnp.float32),
        in_specs=[vmem, vmem, vmem],
        out_specs=vmem,
        compiler_params=pltpu.CompilerParams(vmem_limit_bytes=32 * 1024 * 1024),
    )(p1, packed["wslab"], packed["bslab"])
    return out[:, :class_num]            # drop padded class columns


# ------------------------------ parameter init -------------------------------

def _linear_init(key, fan_in, fan_out):
    kw, kb = jax.random.split(key)
    bound = 1.0 / jnp.sqrt(fan_in)
    w = jax.random.uniform(kw, (fan_in, fan_out), jnp.float32, -bound, bound)
    b = jax.random.uniform(kb, (fan_out,), jnp.float32, -bound, bound)
    return w, b


def _conv_init(key, cout, cin, k):
    kw, kb = jax.random.split(key)
    fan_in = cin * k * k
    bound = 1.0 / jnp.sqrt(fan_in)
    w = jax.random.uniform(kw, (cout, cin, k, k), jnp.float32, -bound, bound)
    b = jax.random.uniform(kb, (cout,), jnp.float32, -bound, bound)
    return w, b


def init_sphereface_params(key, class_num):
    k1, k2, k3, k4 = jax.random.split(key, 4)
    return {
        "conv1": _conv_init(k1, 64, 3, 3),     # Conv2d(3, 64, 3, stride=2)
        "conv2": _conv_init(k2, 128, 64, 3),   # Conv2d(64, 128, 3, stride=2)
        "fc1": _linear_init(k3, 320, 50),      # Linear(320, 50) implied by forward
        "fc2": _linear_init(k4, 50, class_num),
    }


# --------------------------- pure-numpy reference ----------------------------

def _reference_forward(params, x, class_num):
    w1, b1 = [np.asarray(t, np.float32) for t in params["conv1"]]
    w2, b2 = [np.asarray(t, np.float32) for t in params["conv2"]]
    wf1, bf1 = [np.asarray(t, np.float32) for t in params["fc1"]]
    wf2, bf2 = [np.asarray(t, np.float32) for t in params["fc2"]]
    x = np.asarray(x, np.float32)

    def conv(a, w, b, stride=2):
        n, cin, hh, ww = a.shape
        cout, _, k, _ = w.shape
        ho, wo = (hh - k) // stride + 1, (ww - k) // stride + 1
        out = np.zeros((n, cout, ho, wo), np.float32)
        wm = w.reshape(cout, -1).T
        for i in range(ho):
            for j in range(wo):
                patch = a[:, :, i * stride:i * stride + k, j * stride:j * stride + k]
                out[:, :, i, j] = patch.reshape(n, -1) @ wm
        return out + b.reshape(1, cout, 1, 1)

    def pool(a):
        n, c, hh, ww = a.shape
        return a.reshape(n, c, hh // 2, 2, ww // 2, 2).max(axis=(3, 5))

    a = np.maximum(pool(conv(x, w1, b1)), 0.0)
    a = np.maximum(pool(conv(a, w2, b2)), 0.0)
    a = a.reshape(-1, 320)
    h = np.maximum(a @ wf1 + bf1, 0.0)
    logits = h @ wf2 + bf2
    logits = logits - logits.max(axis=-1, keepdims=True)
    return logits - np.log(np.exp(logits).sum(axis=-1, keepdims=True))


if __name__ == "__main__":
    class_num = 10
    key = jax.random.PRNGKey(0)
    kp, kx = jax.random.split(key)

    params = init_sphereface_params(kp, class_num)
    packed = pack_params(params, class_num)

    # Input chosen so the pipeline reaches x.view(-1, 320) cleanly:
    # (5,3,21,21) -> conv1 -> (5,64,10,10) -> pool -> (5,64,5,5)
    # -> conv2 -> (5,128,2,2) -> pool -> (5,128,1,1) -> view -> (2, 320)
    x = jax.random.normal(kx, (5, 3, 21, 21), jnp.float32)

    out = sphereface_forward(packed, x, class_num=class_num)
    out = jax.block_until_ready(out)

    assert out.shape == (2, class_num), out.shape
    # log_softmax rows must (approximately) sum to 1 in prob space.
    assert jnp.allclose(jnp.sum(jnp.exp(out), axis=-1), 1.0, atol=1e-4)
    # Loose check vs. f32 numpy reference (kernel feeds the MXU bf16 operands).
    ref = _reference_forward(params, np.asarray(x), class_num)
    assert np.allclose(np.asarray(out), ref, atol=5e-2), (
        float(np.abs(np.asarray(out) - ref).max()))
    print("KERNEL_OK")
</pallas_src>

<mosaic_0001>
module attributes {stable_mosaic.version = 11 : i64} {
  func.func @_sphereface_fused_kernel(%arg0: memref<512x32xbf16, #tpu.memory_space<vmem>>, %arg1: memref<1920x128xbf16, #tpu.memory_space<vmem>>, %arg2: memref<8x128xf32, #tpu.memory_space<vmem>>, %arg3: memref<2x128xf32, #tpu.memory_space<vmem>>) attributes {dimension_semantics = [], scalar_prefetch = 0 : i64, scratch_operands = 0 : i64, tpu.core_type = #tpu.core_type<tc>} {
    %c0 = arith.constant 0 : index
    %c0_0 = arith.constant 0 : index
    %0 = vector.load %arg2[%c0, %c0_0] : memref<8x128xf32, #tpu.memory_space<vmem>>, vector<1x128xf32>
    %c1 = arith.constant 1 : index
    %c0_1 = arith.constant 0 : index
    %1 = vector.load %arg2[%c1, %c0_1] : memref<8x128xf32, #tpu.memory_space<vmem>>, vector<1x128xf32>
    %c2 = arith.constant 2 : index
    %c0_2 = arith.constant 0 : index
    %2 = vector.load %arg2[%c2, %c0_2] : memref<8x128xf32, #tpu.memory_space<vmem>>, vector<1x64xf32>
    %c3 = arith.constant 3 : index
    %c0_3 = arith.constant 0 : index
    %3 = vector.load %arg2[%c3, %c0_3] : memref<8x128xf32, #tpu.memory_space<vmem>>, vector<1x128xf32>
    %c0_4 = arith.constant 0 : index
    %c0_5 = arith.constant 0 : index
    %4 = vector.load %arg1[%c0_4, %c0_5] : memref<1920x128xbf16, #tpu.memory_space<vmem>>, vector<32x128xbf16>
    %c0_6 = arith.constant 0 : index
    %c0_7 = arith.constant 0 : index
    %5 = vector.load %arg0[%c0_6, %c0_7] : memref<512x32xbf16, #tpu.memory_space<vmem>>, vector<512x32xbf16>
    %cst = arith.constant dense<0.000000e+00> : vector<512x128xf32>
    %6 = tpu.matmul %5, %4, %cst {dimension_numbers = #tpu.dot_dimension_numbers<[1], [0], [0], [1], [0, 0, 1, 1], [], []>} : vector<512x32xbf16>, vector<32x128xbf16>, vector<512x128xf32> -> vector<512x128xf32>
    %7 = vector.extract_strided_slice %6 {offsets = [0, 0], sizes = [128, 128], strides = [1, 1]} : vector<512x128xf32> to vector<128x128xf32>
    %8 = vector.extract_strided_slice %6 {offsets = [128, 0], sizes = [128, 128], strides = [1, 1]} : vector<512x128xf32> to vector<128x128xf32>
    %9 = arith.maximumf %7, %8 : vector<128x128xf32>
    %10 = vector.extract_strided_slice %6 {offsets = [256, 0], sizes = [128, 128], strides = [1, 1]} : vector<512x128xf32> to vector<128x128xf32>
    %11 = vector.extract_strided_slice %6 {offsets = [384, 0], sizes = [128, 128], strides = [1, 1]} : vector<512x128xf32> to vector<128x128xf32>
    %12 = arith.maximumf %10, %11 : vector<128x128xf32>
    %13 = arith.maximumf %9, %12 : vector<128x128xf32>
    %14 = vector.broadcast %0 : vector<1x128xf32> to vector<128x128xf32>
    %15 = arith.addf %13, %14 : vector<128x128xf32>
    %cst_8 = arith.constant 0.000000e+00 : f32
    %16 = vector.broadcast %cst_8 : f32 to vector<128x128xf32>
    %17 = arith.maximumf %15, %16 : vector<128x128xf32>
    %18 = arith.truncf %17 : vector<128x128xf32> to vector<128x128xbf16>
    %c32 = arith.constant 32 : index
    %c0_9 = arith.constant 0 : index
    %19 = vector.load %arg1[%c32, %c0_9] : memref<1920x128xbf16, #tpu.memory_space<vmem>>, vector<288x128xbf16>
    %cst_10 = arith.constant dense<0.000000e+00> : vector<288x128xf32>
    %20 = tpu.matmul %19, %18, %cst_10 {dimension_numbers = #tpu.dot_dimension_numbers<[1], [0], [0], [1], [0, 0, 1, 1], [], []>} : vector<288x128xbf16>, vector<128x128xbf16>, vector<288x128xf32> -> vector<288x128xf32>
    %21 = arith.truncf %20 : vector<288x128xf32> to vector<288x128xbf16>
    %cst_11 = arith.constant 0.000000e+00 : f32
    %22 = vector.broadcast %cst_11 : f32 to vector<32x128xf32>
    %c320 = arith.constant 320 : index
    %c0_12 = arith.constant 0 : index
    %23 = vector.load %arg1[%c320, %c0_12] : memref<1920x128xbf16, #tpu.memory_space<vmem>>, vector<128x128xbf16>
    %24 = vector.extract_strided_slice %21 {offsets = [0, 0], sizes = [32, 128], strides = [1, 1]} : vector<288x128xbf16> to vector<32x128xbf16>
    %cst_13 = arith.constant dense<0.000000e+00> : vector<32x128xf32>
    %25 = tpu.matmul %24, %23, %cst_13 {dimension_numbers = #tpu.dot_dimension_numbers<[1], [0], [0], [1], [0, 0, 1, 1], [], []>} : vector<32x128xbf16>, vector<128x128xbf16>, vector<32x128xf32> -> vector<32x128xf32>
    %26 = arith.addf %22, %25 : vector<32x128xf32>
    %c448 = arith.constant 448 : index
    %c0_14 = arith.constant 0 : index
    %27 = vector.load %arg1[%c448, %c0_14] : memref<1920x128xbf16, #tpu.memory_space<vmem>>, vector<128x128xbf16>
    %28 = vector.extract_strided_slice %21 {offsets = [32, 0], sizes = [32, 128], strides = [1, 1]} : vector<288x128xbf16> to vector<32x128xbf16>
    %cst_15 = arith.constant dense<0.000000e+00> : vector<32x128xf32>
    %29 = tpu.matmul %28, %27, %cst_15 {dimension_numbers = #tpu.dot_dimension_numbers<[1], [0], [0], [1], [0, 0, 1, 1], [], []>} : vector<32x128xbf16>, vector<128x128xbf16>, vector<32x128xf32> -> vector<32x128xf32>
    %30 = arith.addf %26, %29 : vector<32x128xf32>
    %c576 = arith.constant 576 : index
    %c0_16 = arith.constant 0 : index
    %31 = vector.load %arg1[%c576, %c0_16] : memref<1920x128xbf16, #tpu.memory_space<vmem>>, vector<128x128xbf16>
    %32 = vector.extract_strided_slice %21 {offsets = [64, 0], sizes = [32, 128], strides = [1, 1]} : vector<288x128xbf16> to vector<32x128xbf16>
    %cst_17 = arith.constant dense<0.000000e+00> : vector<32x128xf32>
    %33 = tpu.matmul %32, %31, %cst_17 {dimension_numbers = #tpu.dot_dimension_numbers<[1], [0], [0], [1], [0, 0, 1, 1], [], []>} : vector<32x128xbf16>, vector<128x128xbf16>, vector<32x128xf32> -> vector<32x128xf32>
    %34 = arith.addf %30, %33 : vector<32x128xf32>
    %c704 = arith.constant 704 : index
    %c0_18 = arith.constant 0 : index
    %35 = vector.load %arg1[%c704, %c0_18] : memref<1920x128xbf16, #tpu.memory_space<vmem>>, vector<128x128xbf16>
    %36 = vector.extract_strided_slice %21 {offsets = [96, 0], sizes = [32, 128], strides = [1, 1]} : vector<288x128xbf16> to vector<32x128xbf16>
    %cst_19 = arith.constant dense<0.000000e+00> : vector<32x128xf32>
    %37 = tpu.matmul %36, %35, %cst_19 {dimension_numbers = #tpu.dot_dimension_numbers<[1], [0], [0], [1], [0, 0, 1, 1], [], []>} : vector<32x128xbf16>, vector<128x128xbf16>, vector<32x128xf32> -> vector<32x128xf32>
    %38 = arith.addf %34, %37 : vector<32x128xf32>
    %c832 = arith.constant 832 : index
    %c0_20 = arith.constant 0 : index
    %39 = vector.load %arg1[%c832, %c0_20] : memref<1920x128xbf16, #tpu.memory_space<vmem>>, vector<128x128xbf16>
    %40 = vector.extract_strided_slice %21 {offsets = [128, 0], sizes = [32, 128], strides = [1, 1]} : vector<288x128xbf16> to vector<32x128xbf16>
    %cst_21 = arith.constant dense<0.000000e+00> : vector<32x128xf32>
    %41 = tpu.matmul %40, %39, %cst_21 {dimension_numbers = #tpu.dot_dimension_numbers<[1], [0], [0], [1], [0, 0, 1, 1], [], []>} : vector<32x128xbf16>, vector<128x128xbf16>, vector<32x128xf32> -> vector<32x128xf32>
    %42 = arith.addf %38, %41 : vector<32x128xf32>
    %c960 = arith.constant 960 : index
    %c0_22 = arith.constant 0 : index
    %43 = vector.load %arg1[%c960, %c0_22] : memref<1920x128xbf16, #tpu.memory_space<vmem>>, vector<128x128xbf16>
    %44 = vector.extract_strided_slice %21 {offsets = [160, 0], sizes = [32, 128], strides = [1, 1]} : vector<288x128xbf16> to vector<32x128xbf16>
    %cst_23 = arith.constant dense<0.000000e+00> : vector<32x128xf32>
    %45 = tpu.matmul %44, %43, %cst_23 {dimension_numbers = #tpu.dot_dimension_numbers<[1], [0], [0], [1], [0, 0, 1, 1], [], []>} : vector<32x128xbf16>, vector<128x128xbf16>, vector<32x128xf32> -> vector<32x128xf32>
    %46 = arith.addf %42, %45 : vector<32x128xf32>
    %c1088 = arith.constant 1088 : index
    %c0_24 = arith.constant 0 : index
    %47 = vector.load %arg1[%c1088, %c0_24] : memref<1920x128xbf16, #tpu.memory_space<vmem>>, vector<128x128xbf16>
    %48 = vector.extract_strided_slice %21 {offsets = [192, 0], sizes = [32, 128], strides = [1, 1]} : vector<288x128xbf16> to vector<32x128xbf16>
    %cst_25 = arith.constant dense<0.000000e+00> : vector<32x128xf32>
    %49 = tpu.matmul %48, %47, %cst_25 {dimension_numbers = #tpu.dot_dimension_numbers<[1], [0], [0], [1], [0, 0, 1, 1], [], []>} : vector<32x128xbf16>, vector<128x128xbf16>, vector<32x128xf32> -> vector<32x128xf32>
    %50 = arith.addf %46, %49 : vector<32x128xf32>
    %c1216 = arith.constant 1216 : index
    %c0_26 = arith.constant 0 : index
    %51 = vector.load %arg1[%c1216, %c0_26] : memref<1920x128xbf16, #tpu.memory_space<vmem>>, vector<128x128xbf16>
    %52 = vector.extract_strided_slice %21 {offsets = [224, 0], sizes = [32, 128], strides = [1, 1]} : vector<288x128xbf16> to vector<32x128xbf16>
    %cst_27 = arith.constant dense<0.000000e+00> : vector<32x128xf32>
    %53 = tpu.matmul %52, %51, %cst_27 {dimension_numbers = #tpu.dot_dimension_numbers<[1], [0], [0], [1], [0, 0, 1, 1], [], []>} : vector<32x128xbf16>, vector<128x128xbf16>, vector<32x128xf32> -> vector<32x128xf32>
    %54 = arith.addf %50, %53 : vector<32x128xf32>
    %c1344 = arith.constant 1344 : index
    %c0_28 = arith.constant 0 : index
    %55 = vector.load %arg1[%c1344, %c0_28] : memref<1920x128xbf16, #tpu.memory_space<vmem>>, vector<128x128xbf16>
    %56 = vector.extract_strided_slice %21 {offsets = [256, 0], sizes = [32, 128], strides = [1, 1]} : vector<288x128xbf16> to vector<32x128xbf16>
    %cst_29 = arith.constant dense<0.000000e+00> : vector<32x128xf32>
    %57 = tpu.matmul %56, %55, %cst_29 {dimension_numbers = #tpu.dot_dimension_numbers<[1], [0], [0], [1], [0, 0, 1, 1], [], []>} : vector<32x128xbf16>, vector<128x128xbf16>, vector<32x128xf32> -> vector<32x128xf32>
    %58 = arith.addf %54, %57 : vector<32x128xf32>
    %59 = vector.broadcast %1 : vector<1x128xf32> to vector<32x128xf32>
    %60 = arith.addf %58, %59 : vector<32x128xf32>
    %61 = vector.extract_strided_slice %60 {offsets = [0, 0], sizes = [8, 128], strides = [1, 1]} : vector<32x128xf32> to vector<8x128xf32>
    %62 = vector.extract_strided_slice %60 {offsets = [8, 0], sizes = [8, 128], strides = [1, 1]} : vector<32x128xf32> to vector<8x128xf32>
    %63 = arith.maximumf %61, %62 : vector<8x128xf32>
    %64 = vector.extract_strided_slice %60 {offsets = [16, 0], sizes = [8, 128], strides = [1, 1]} : vector<32x128xf32> to vector<8x128xf32>
    %65 = vector.extract_strided_slice %60 {offsets = [24, 0], sizes = [8, 128], strides = [1, 1]} : vector<32x128xf32> to vector<8x128xf32>
    %66 = arith.maximumf %64, %65 : vector<8x128xf32>
    %67 = arith.maximumf %63, %66 : vector<8x128xf32>
    %cst_30 = arith.constant 0.000000e+00 : f32
    %68 = vector.broadcast %cst_30 : f32 to vector<8x128xf32>
    %69 = arith.maximumf %67, %68 : vector<8x128xf32>
    %70 = arith.truncf %69 : vector<8x128xf32> to vector<8x128xbf16>
    %c1472 = arith.constant 1472 : index
    %c0_31 = arith.constant 0 : index
    %71 = vector.load %arg1[%c1472, %c0_31] : memref<1920x128xbf16, #tpu.memory_space<vmem>>, vector<128x128xbf16>
    %cst_32 = arith.constant dense<0.000000e+00> : vector<8x128xf32>
    %72 = tpu.matmul %70, %71, %cst_32 {dimension_numbers = #tpu.dot_dimension_numbers<[1], [0], [0], [1], [0, 0, 1, 1], [], []>} : vector<8x128xbf16>, vector<128x128xbf16>, vector<8x128xf32> -> vector<8x128xf32>
    %c1600 = arith.constant 1600 : index
    %c0_33 = arith.constant 0 : index
    %73 = vector.load %arg1[%c1600, %c0_33] : memref<1920x128xbf16, #tpu.memory_space<vmem>>, vector<128x128xbf16>
    %cst_34 = arith.constant dense<0.000000e+00> : vector<8x128xf32>
    %74 = tpu.matmul %70, %73, %cst_34 {dimension_numbers = #tpu.dot_dimension_numbers<[1], [0], [0], [1], [0, 0, 1, 1], [], []>} : vector<8x128xbf16>, vector<128x128xbf16>, vector<8x128xf32> -> vector<8x128xf32>
    %c1728 = arith.constant 1728 : index
    %c0_35 = arith.constant 0 : index
    %75 = vector.load %arg1[%c1728, %c0_35] : memref<1920x128xbf16, #tpu.memory_space<vmem>>, vector<128x128xbf16>
    %cst_36 = arith.constant dense<0.000000e+00> : vector<8x128xf32>
    %76 = tpu.matmul %70, %75, %cst_36 {dimension_numbers = #tpu.dot_dimension_numbers<[1], [0], [0], [1], [0, 0, 1, 1], [], []>} : vector<8x128xbf16>, vector<128x128xbf16>, vector<8x128xf32> -> vector<8x128xf32>
    %77 = vector.extract_strided_slice %72 {offsets = [0, 0], sizes = [1, 64], strides = [1, 1]} : vector<8x128xf32> to vector<1x64xf32>
    %78 = vector.extract_strided_slice %72 {offsets = [1, 64], sizes = [1, 64], strides = [1, 1]} : vector<8x128xf32> to vector<1x64xf32>
    %79 = arith.addf %77, %78 : vector<1x64xf32>
    %80 = vector.extract_strided_slice %74 {offsets = [2, 0], sizes = [1, 64], strides = [1, 1]} : vector<8x128xf32> to vector<1x64xf32>
    %81 = arith.addf %79, %80 : vector<1x64xf32>
    %82 = vector.extract_strided_slice %74 {offsets = [2, 64], sizes = [1, 64], strides = [1, 1]} : vector<8x128xf32> to vector<1x64xf32>
    %83 = vector.extract_strided_slice %76 {offsets = [3, 0], sizes = [1, 64], strides = [1, 1]} : vector<8x128xf32> to vector<1x64xf32>
    %84 = arith.addf %82, %83 : vector<1x64xf32>
    %85 = vector.extract_strided_slice %76 {offsets = [4, 64], sizes = [1, 64], strides = [1, 1]} : vector<8x128xf32> to vector<1x64xf32>
    %86 = arith.addf %84, %85 : vector<1x64xf32>
    %87 = tpu.concatenate %81, %86 in 0 : vector<1x64xf32>, vector<1x64xf32> -> vector<2x64xf32>
    %88 = vector.broadcast %2 : vector<1x64xf32> to vector<2x64xf32>
    %89 = arith.addf %87, %88 : vector<2x64xf32>
    %cst_37 = arith.constant 0.000000e+00 : f32
    %90 = vector.broadcast %cst_37 : f32 to vector<2x64xf32>
    %91 = arith.maximumf %89, %90 : vector<2x64xf32>
    %c1856 = arith.constant 1856 : index
    %c0_38 = arith.constant 0 : index
    %92 = vector.load %arg1[%c1856, %c0_38] : memref<1920x128xbf16, #tpu.memory_space<vmem>>, vector<64x128xbf16>
    %93 = arith.truncf %91 : vector<2x64xf32> to vector<2x64xbf16>
    %cst_39 = arith.constant dense<0.000000e+00> : vector<2x128xf32>
    %94 = tpu.matmul %93, %92, %cst_39 {dimension_numbers = #tpu.dot_dimension_numbers<[1], [0], [0], [1], [0, 0, 1, 1], [], []>} : vector<2x64xbf16>, vector<64x128xbf16>, vector<2x128xf32> -> vector<2x128xf32>
    %95 = vector.broadcast %3 : vector<1x128xf32> to vector<2x128xf32>
    %96 = arith.addf %94, %95 : vector<2x128xf32>
    %cst_40 = arith.constant dense<0xFF800000> : vector<2xf32>
    %97 = vector.multi_reduction <maximumf>, %96, %cst_40 [1] : vector<2x128xf32> to vector<2xf32>
    %98 = vector.shape_cast %97 : vector<2xf32> to vector<2x1xf32>
    %99 = vector.broadcast %98 : vector<2x1xf32> to vector<2x128xf32>
    %100 = arith.subf %96, %99 : vector<2x128xf32>
    %101 = math.exp %100 : vector<2x128xf32>
    %cst_41 = arith.constant dense<0.000000e+00> : vector<2xf32>
    %102 = vector.multi_reduction <add>, %101, %cst_41 [1] : vector<2x128xf32> to vector<2xf32>
    %103 = vector.shape_cast %102 : vector<2xf32> to vector<2x1xf32>
    %104 = math.log %103 : vector<2x1xf32>
    %105 = vector.broadcast %104 : vector<2x1xf32> to vector<2x128xf32>
    %106 = arith.subf %100, %105 : vector<2x128xf32>
    %c0_42 = arith.constant 0 : index
    %c0_43 = arith.constant 0 : index
    %107 = vector.load %arg3[%c0_42, %c0_43] : memref<2x128xf32, #tpu.memory_space<vmem>>, vector<2x128xf32>
    tpu.vector_store %arg3[%c0_42, %c0_43], %106 {strides = array<i32>} : memref<2x128xf32, #tpu.memory_space<vmem>>, vector<2x128xf32>,
    return
  }
}

</mosaic_0001>

<bundles_post_ra>
// kernel: sphereface_forward.1
= control target key start
LH: loop header
LB: loop body
LE: loop exit
PB: predicated region body
PF: predicated region fallthrough
CT: control target
= control target key end

     0   :  { %vm260_vm0 = vcmask 261120   ;;  %s4285_s0 = inlined_call_operand.vmem [shape: bf16[512,32], index: 0, kind: input, shape index: {}]   ;;  %s4286_s1 = inlined_call_operand.vmem [shape: bf16[1920,128], index: 1, kind: input, shape index: {}]   ;;  %s4287_s2 = inlined_call_operand.vmem [shape: f32[8,128], index: 2, kind: input, shape index: {}]   ;;  %s4288_s3 = inlined_call_operand.hbm [shape: f32[2,128], index: 3, kind: output, shape index: {}]  }
   0x1   :  { %v3335_v0 = vld [vmem:[%s4286_s1 + $0x8] sm:$0xff]   ;;  %v3336_v1 = vld [vmem:[%s4286_s1] sm:$0xff]   ;;  %v3339_v4 = vld [vmem:[%s4285_s0 + $0x10] sm:$0xff]  }
   0x2   :  { %2959 = vmatprep.subr.bf16.mxu0 %v3335_v0  ;;  %v3337_v2 = vld [vmem:[%s4285_s0] sm:$0xff]   ;;  %v3338_v3 = vld [vmem:[%s4285_s0 + $0x8] sm:$0xff]   ;;  %v3340_v5 = vld [vmem:[%s4285_s0 + $0x18] sm:$0xff]  }
   0x3   :  { %2960 = vmatpush3.bf16.msra.mxu0 %v3335_v0  ;;  %2963 = vmatprep.mubr.msk.bf16.mxu0 %vm260_vm0, %v3337_v2  ;;  %v3341_v6 = vld [vmem:[%s4285_s0 + $0x20] sm:$0xff]   ;;  %v3342_v7 = vld [vmem:[%s4285_s0 + $0x28] sm:$0xff]   ;;  %v3343_v8 = vld [vmem:[%s4285_s0 + $0x30] sm:$0xff]  }
   0x4   :  { %2961 = vmatprep.subr.bf16.mxu0 %v3336_v1  ;;  %v3344_v9 = vld [vmem:[%s4285_s0 + $0x38] sm:$0xff]   ;;  %v3345_v10 = vld [vmem:[%s4285_s0 + $0x40] sm:$0xff]   ;;  %v3346_v11 = vld [vmem:[%s4285_s0 + $0x48] sm:$0xff]  }
   0x5   :  { %v3347_v12 = vld [vmem:[%s4285_s0 + $0x50] sm:$0xff]   ;;  %v3348_v13 = vld [vmem:[%s4285_s0 + $0x58] sm:$0xff]   ;;  %v3349_v14 = vld [vmem:[%s4285_s0 + $0x60] sm:$0xff]  }
   0x6   :  { %v3350_v15 = vld [vmem:[%s4285_s0 + $0x68] sm:$0xff]   ;;  %v3351_v16 = vld [vmem:[%s4285_s0 + $0x70] sm:$0xff]   ;;  %v3352_v17 = vld [vmem:[%s4285_s0 + $0x78] sm:$0xff]  }
   0x7   :  { %2962 = vmatpush3.bf16.msra.mxu0 %v3336_v1  ;;  %v3353_v18 = vld [vmem:[%s4285_s0 + $0x80] sm:$0xff]   ;;  %v3354_v19 = vld [vmem:[%s4285_s0 + $0x88] sm:$0xff]   ;;  %v3355_v20 = vld [vmem:[%s4285_s0 + $0x90] sm:$0xff]  }
   0x8   :  { %v3356_v21 = vld [vmem:[%s4285_s0 + $0x98] sm:$0xff]   ;;  %v3357_v22 = vld [vmem:[%s4285_s0 + $0xa0] sm:$0xff]   ;;  %v3358_v23 = vld [vmem:[%s4285_s0 + $0xa8] sm:$0xff]  }
   0x9   :  { %v3359_v24 = vld [vmem:[%s4285_s0 + $0xb0] sm:$0xff]   ;;  %v3360_v25 = vld [vmem:[%s4285_s0 + $0xb8] sm:$0xff]   ;;  %v3361_v26 = vld [vmem:[%s4285_s0 + $0xc0] sm:$0xff]  }
   0xa   :  { %2964 = vmatmul.mubr.msk.bf16.vlgmr.msra.gmra.mxu0 %vm260_vm0, %v3338_v3  ;;  %v3362_v27 = vld [vmem:[%s4285_s0 + $0xc8] sm:$0xff]   ;;  %v3363_v28 = vld [vmem:[%s4285_s0 + $0xd0] sm:$0xff]   ;;  %v3364_v29 = vld [vmem:[%s4285_s0 + $0xd8] sm:$0xff]  }
   0xb   :  { %2967 = vmatprep.mubr.msk.bf16.mxu0 %vm260_vm0, %v3339_v4  ;;  %v3365_v30 = vld [vmem:[%s4285_s0 + $0xe0] sm:$0xff]  }
  0x12   :  { %2968 = vmatmul.mubr.msk.bf16.gmra.mxu0 %vm260_vm0, %v3340_v5 }
  0x13   :  { %2971 = vmatprep.mubr.msk.bf16.mxu0 %vm260_vm0, %v3341_v6 }
  0x1a   :  { %2972 = vmatmul.mubr.msk.bf16.gmra.mxu0 %vm260_vm0, %v3342_v7 }
  0x1b   :  { %2975 = vmatprep.mubr.msk.bf16.mxu0 %vm260_vm0, %v3343_v8 }
  0x22   :  { %2976 = vmatmul.mubr.msk.bf16.gmra.mxu0 %vm260_vm0, %v3344_v9 }
  0x23   :  { %2979 = vmatprep.mubr.msk.bf16.mxu0 %vm260_vm0, %v3345_v10 }
  0x2a   :  { %2980 = vmatmul.mubr.msk.bf16.gmra.mxu0 %vm260_vm0, %v3346_v11 }
  0x2b   :  { %2983 = vmatprep.mubr.msk.bf16.mxu0 %vm260_vm0, %v3347_v12 }
  0x32   :  { %2984 = vmatmul.mubr.msk.bf16.gmra.mxu0 %vm260_vm0, %v3348_v13 }
  0x33   :  { %2987 = vmatprep.mubr.msk.bf16.mxu0 %vm260_vm0, %v3349_v14 }
  0x3a   :  { %2988 = vmatmul.mubr.msk.bf16.gmra.mxu0 %vm260_vm0, %v3350_v15 }
  0x3b   :  { %2991 = vmatprep.mubr.msk.bf16.mxu0 %vm260_vm0, %v3351_v16 }
  0x42   :  { %2992 = vmatmul.mubr.msk.bf16.gmra.mxu0 %vm260_vm0, %v3352_v17 }
  0x43   :  { %2995 = vmatprep.mubr.msk.bf16.mxu0 %vm260_vm0, %v3353_v18 }
  0x4a   :  { %2996 = vmatmul.mubr.msk.bf16.gmra.mxu0 %vm260_vm0, %v3354_v19 }
  0x4b   :  { %2999 = vmatprep.mubr.msk.bf16.mxu0 %vm260_vm0, %v3355_v20 }
  0x52   :  { %3000 = vmatmul.mubr.msk.bf16.gmra.mxu0 %vm260_vm0, %v3356_v21 }
  0x53   :  { %3003 = vmatprep.mubr.msk.bf16.mxu0 %vm260_vm0, %v3357_v22 }
  0x5a   :  { %3004 = vmatmul.mubr.msk.bf16.gmra.mxu0 %vm260_vm0, %v3358_v23 }
  0x5b   :  { %3007 = vmatprep.mubr.msk.bf16.mxu0 %vm260_vm0, %v3359_v24 }
  0x62   :  { %3008 = vmatmul.mubr.msk.bf16.gmra.mxu0 %vm260_vm0, %v3360_v25 }
  0x63   :  { %3011 = vmatprep.mubr.msk.bf16.mxu0 %vm260_vm0, %v3361_v26 }
  0x6a   :  { %3012 = vmatmul.mubr.msk.bf16.gmra.mxu0 %vm260_vm0, %v3362_v27 }
  0x6b   :  { %3015 = vmatprep.mubr.msk.bf16.mxu0 %vm260_vm0, %v3363_v28 }
  0x6c   :  { %8 = vsyncpa [#allocation3], 0  ;;  %v3366_v31 = vld [vmem:[%s4285_s0 + $0xe8] sm:$0xff]   ;;  %v3367_v32 = vld [vmem:[%s4285_s0 + $0xf0] sm:$0xff]   ;;  %vm3514_vm1 = vmmov 0   ;;  %s3515_s10 = smov 64  }
  0x6d   :  { %v3368_v33 = vld [vmem:[%s4285_s0 + $0xf8] sm:$0xff]   ;;  %v3369_v55 = vld [vmem:[%s4286_s1 + $0x10] sm:$0xff]   ;;  %v3789_v14 = vld [vmem:[%s4287_s2] ss:$0 sm:$0xff]  ;;  %vm2471_vm2 = vcmask 1040384   ;;  %vm2516_vm3 = vcmask 523264  }
  0x6e   :  { %3043 = vmatprep.mubr.bf16.mxu1 %v3369_v55  ;;  %vm2560_vm4 = vcmask 1041408   ;;  %s3516_s18 = smov [#allocation2]  }
  0x72   :  { %3016 = vmatmul.mubr.msk.bf16.gmra.mxu0 %vm260_vm0, %v3364_v29 }
  0x73   :  { %3019 = vmatprep.mubr.msk.bf16.mxu0 %vm260_vm0, %v3365_v30 }
  0x7a   :  { %3020 = vmatmul.mubr.msk.bf16.gmra.mxu0 %vm260_vm0, %v3366_v31 }
  0x7b   :  { %3023 = vmatprep.mubr.msk.bf16.mxu0 %vm260_vm0, %v3367_v32 }
  0x82   :  { %3024 = vmatmul.mubr.msk.bf16.gmra.mxu0 %vm260_vm0, %v3368_v33 }
  0xca   :  { %v3671_v34 = vpop.f32.mrf.mxu0 }
  0xcc   :  { %v3673_v35 = vpop.f32.mrf.mxu0 }
  0xce   :  { %v3675_v36 = vpop.f32.mrf.mxu0 }
  0xd0   :  { %v3677_v37 = vpop.f32.mrf.mxu0 }
  0xd2   :  { %v3679_v38 = vpop.f32.mrf.mxu0 }
  0xd4   :  { %v3681_v39 = vpop.f32.mrf.mxu0 }
  0xd6   :  { %v3683_v40 = vpop.f32.mrf.mxu0 }
  0xd8   :  { %v3685_v41 = vpop.f32.mrf.mxu0 }
  0xda   :  { %v3687_v42 = vpop.f32.mrf.mxu0 }
  0xdc   :  { %v3689_v43 = vpop.f32.mrf.mxu0 }
  0xde   :  { %v3691_v44 = vpop.f32.mrf.mxu0 }
  0xe0   :  { %v3693_v45 = vpop.f32.mrf.mxu0 }
  0xe2   :  { %v3695_v46 = vpop.f32.mrf.mxu0 }
  0xe4   :  { %v3697_v47 = vpop.f32.mrf.mxu0 }
  0xe6   :  { %v3699_v48 = vpop.f32.mrf.mxu0 }
  0xe8   :  { %v3701_v49 = vpop.f32.mrf.mxu0 }
  0xea   :  { %v2981_v50 = vpop.f32.mrf.mxu0 }
  0xeb   :  { %v648_v51 = vmax.f32 %v3671_v34, %v2981_v50 }
  0xec   :  { %v455_v52 = vpop.f32.mrf.mxu0 }
  0xed   :  { %v646_v53 = vmax.f32 %v3673_v35, %v455_v52  ;;  %v3385_v35 = vld [vmem:[%s4286_s1 + $0xd8] sm:$0xff]  }
  0xee   :  { %v3705_v54 = vpop.f32.mrf.mxu0  ;;  %3099 = vmatprep.subr.bf16.mxu0 %v3385_v35 }
  0xef   :  { %v649_v56 = vmax.f32 %v3675_v36, %v3705_v54  ;;  %v3386_v36 = vld [vmem:[%s4286_s1 + $0xd0] sm:$0xff]   ;;  %3100 = vmatpush3.bf16.msra.mxu0 %v3385_v35  ;;  %v3393_v35 = vld [vmem:[%s4286_s1 + $0xc0] sm:$0xff]  }
  0xf0   :  { %v3712_v57 = vpop.f32.mrf.mxu0  ;;  %3101 = vmatprep.subr.bf16.mxu0 %v3386_v36 }
  0xf1   :  { %v647_v58 = vmax.f32 %v3677_v37, %v3712_v57  ;;  %v3396_v37 = vld [vmem:[%s4286_s1 + $0xb8] sm:$0xff]  }
  0xf2   :  { %v3716_v59 = vpop.f32.mrf.mxu0 }
  0xf3   :  { %v652_v60 = vmax.f32 %v3679_v38, %v3716_v59  ;;  %3102 = vmatpush3.bf16.msra.mxu0 %v3386_v36 }
  0xf4   :  { %v3720_v61 = vpop.f32.mrf.mxu0 }
  0xf5   :  { %v650_v62 = vmax.f32 %v3681_v39, %v3720_v61 }
  0xf6   :  { %v3724_v63 = vpop.f32.mrf.mxu0 }
  0xf7   :  { %v653_v0 = vmax.f32 %v3683_v40, %v3724_v63 }
  0xf8   :  { %v3728_v1 = vpop.f32.mrf.mxu0 }
  0xf9   :  { %v651_v2 = vmax.f32 %v3685_v41, %v3728_v1 }
  0xfa   :  { %v3732_v3 = vpop.f32.mrf.mxu0 }
  0xfc   :  { %v3736_v5 = vpop.f32.mrf.mxu0 }
  0xfe   :  { %v3740_v7 = vpop.f32.mrf.mxu0 }
 0x100   :  { %v3744_v9 = vpop.f32.mrf.mxu0 }
 0x102   :  { %v3748_v11 = vpop.f32.mrf.mxu0 }
 0x104   :  { %v3752_v13 = vpop.f32.mrf.mxu0 }
 0x106   :  { %v3756_v15 = vpop.f32.mrf.mxu0 }
 0x108   :  { %v3760_v17 = vpop.f32.mrf.mxu0 }
 0x10a   :  { %v2997_v19 = vpop.f32.mrf.mxu0 }
 0x10c   :  { %v519_v20 = vpop.f32.mrf.mxu0 }
 0x10e   :  { %v2998_v21 = vpop.f32.mrf.mxu0 }
 0x110   :  { %v522_v22 = vpop.f32.mrf.mxu0 }
 0x112   :  { %v3001_v23 = vpop.f32.mrf.mxu0 }
 0x114   :  { %v535_v24 = vpop.f32.mrf.mxu0 }
 0x116   :  { %v3002_v25 = vpop.f32.mrf.mxu0 }
 0x118   :  { %v538_v26 = vpop.f32.mrf.mxu0 }
 0x11a   :  { %v3764_v27 = vpop.f32.mrf.mxu0 }
 0x11c   :  { %v3766_v28 = vpop.f32.mrf.mxu0 }
 0x11e   :  { %v3768_v29 = vpop.f32.mrf.mxu0 }
 0x120   :  { %v3770_v30 = vpop.f32.mrf.mxu0 }
 0x122   :  { %v3772_v31 = vpop.f32.mrf.mxu0 }
 0x124   :  { %v3774_v32 = vpop.f32.mrf.mxu0 }
 0x126   :  { %v3776_v33 = vpop.f32.mrf.mxu0 }
 0x128   :  { %v3778_v34 = vpop.f32.mrf.mxu0 }
 0x12a   :  { %v3013_v50 = vpop.f32.mrf.mxu0 }
 0x12b   :  { %v664_v52 = vmax.f32 %v2997_v19, %v3013_v50  ;;  %v3390_v19 = vld [vmem:[%s4286_s1 + $0xc8] sm:$0xff]  }
 0x12c   :  { %v583_v54 = vpop.f32.mrf.mxu0  ;;  %3103 = vmatprep.subr.bf16.mxu0 %v3390_v19 }
 0x12d   :  { %v680_v55 = vmax.f32 %v648_v51, %v664_v52  ;;  %v662_v18 = vmax.f32 %v519_v20, %v583_v54  ;;  %3104 = vmatpush3.bf16.msra.mxu0 %v3390_v19 }
 0x12e   :  { %v3014_v16 = vpop.f32.mrf.mxu0  ;;  %3105 = vmatprep.subr.bf16.mxu0 %v3393_v35 }
 0x12f   :  { %v678_v12 = vmax.f32 %v646_v53, %v662_v18  ;;  %v665_v10 = vmax.f32 %v2998_v21, %v3014_v16  ;;  %v700_v51 = vadd.f32 %v3789_v14, %v680_v55 }
 0x130   :  { %v586_v8 = vpop.f32.mrf.mxu0 }
 0x131   :  { %v681_v6 = vmax.f32 %v649_v56, %v665_v10  ;;  %v663_v4 = vmax.f32 %v522_v22, %v586_v8  ;;  %v698_v56 = vadd.f32 %v3789_v14, %v678_v12  ;;  %v716_v57 = vmax.f32 %v700_v51, 0.0  ;;  %3106 = vmatpush3.bf16.msra.mxu0 %v3393_v35 }
 0x132   :  { %v3017_v20 = vpop.f32.mrf.mxu0  ;;  %3107 = vmatprep.subr.bf16.mxu0 %v3396_v37  ;;  %v4289_v51 = vmax.f32 %v3687_v42, %v3732_v3 }
 0x133   :  { %v701_v50 = vadd.f32 %v3789_v14, %v681_v6  ;;  %v679_v53 = vmax.f32 %v647_v58, %v663_v4  ;;  %v668_v16 = vmax.f32 %v3001_v23, %v3017_v20  ;;  %v714_v23 = vmax.f32 %v698_v56, 0.0 }
 0x134   :  { %v599_v8 = vpop.f32.mrf.mxu0 }
 0x135   :  { %v717_v10 = vmax.f32 %v701_v50, 0.0  ;;  %v699_v18 = vadd.f32 %v3789_v14, %v679_v53  ;;  %v684_v21 = vmax.f32 %v652_v60, %v668_v16  ;;  %v666_v22 = vmax.f32 %v535_v24, %v599_v8  ;;  %v3398_v60 = vld [vmem:[%s4286_s1 + $0xb0] sm:$0xff]   ;;  %3108 = vmatpush3.bf16.msra.mxu0 %v3396_v37 }
 0x136   :  { %v3018_v58 = vpop.f32.mrf.mxu0  ;;  %3109 = vmatprep.subr.bf16.mxu0 %v3398_v60 }
 0x137   :  { %v715_v4 = vmax.f32 %v699_v18, 0.0  ;;  %v682_v6 = vmax.f32 %v650_v62, %v666_v22  ;;  %v669_v12 = vmax.f32 %v3002_v25, %v3018_v58  ;;  %v3813_v52 = vpack.c.bf16 %v717_v10, %v716_v57 }
 0x138   :  { %v602_v36 = vpop.f32.mrf.mxu0  ;;  %v704_v24 = vadd.f32 %v3789_v14, %v684_v21  ;;  %v4292_v18 = vmax.f32 %v3693_v45, %v3744_v9  ;;  %v4294_v45 = vmax.f32 %v3697_v47, %v3752_v13  ;;  %v4296_v47 = vmax.f32 %v3701_v49, %v3760_v17  ;;  %v3389_v49 = vld [vmem:[%s4286_s1 + $0x118] sm:$0xff]   ;;  %v3371_v17 = vld [vmem:[%s4286_s1 + $0x20] sm:$0xff]  }
 0x139   :  { %v685_v38 = vmax.f32 %v653_v0, %v669_v12  ;;  %v667_v59 = vmax.f32 %v538_v26, %v602_v36  ;;  %v3822_v61 = vpack.c.bf16 %v715_v4, %v714_v23  ;;  %v702_v63 = vadd.f32 %v3789_v14, %v682_v6  ;;  %3110 = vmatpush3.bf16.msra.mxu0 %v3398_v60 }
 0x13a   :  { %v3021_v39 = vpop.f32.mrf.mxu0  ;;  %v720_v19 = vmax.f32 %v704_v24, 0.0 }
 0x13b   :  { %v705_v62 = vadd.f32 %v3789_v14, %v685_v38  ;;  %v683_v25 = vmax.f32 %v651_v2, %v667_v59  ;;  %v672_v40 = vmax.f32 %v3764_v27, %v3021_v39  ;;  %v718_v2 = vmax.f32 %v702_v63, 0.0  ;;  %v3373_v63 = vld [vmem:[%s4286_s1 + $0x30] sm:$0xff]  }
 0x13c   :  { %v615_v0 = vpop.f32.mrf.mxu0  ;;  %v4290_v27 = vmax.f32 %v3689_v43, %v3736_v5  ;;  %v4295_v38 = vmax.f32 %v3699_v48, %v3756_v15 }
 0x13d   :  { %v721_v26 = vmax.f32 %v705_v62, 0.0  ;;  %v703_v54 = vadd.f32 %v3789_v14, %v683_v25  ;;  %v670_v55 = vmax.f32 %v3766_v28, %v615_v0  ;;  %v688_v20 = vmax.f32 %v4289_v51, %v672_v40  ;;  %v3392_v40 = vld [vmem:[%s4286_s1 + $0x108] sm:$0xff]   ;;  %v3394_v0 = vld [vmem:[%s4286_s1 + $0x100] sm:$0xff]  }
 0x13e   :  { %v3022_v35 = vpop.f32.mrf.mxu0  ;;  %v4291_v28 = vmax.f32 %v3691_v44, %v3740_v7  ;;  %v4293_v7 = vmax.f32 %v3695_v46, %v3748_v11  ;;  %v3399_v51 = vld [vmem:[%s4286_s1 + $0xe8] sm:$0xff]  }
 0x13f   :  { %v719_v41 = vmax.f32 %v703_v54, 0.0  ;;  %v673_v1 = vmax.f32 %v3768_v29, %v3022_v35  ;;  %v686_v50 = vmax.f32 %v4290_v27, %v670_v55  ;;  %v733_v16 = vpack.c.bf16 %v721_v26, %v720_v19  ;;  %v3395_v26 = vld [vmem:[%s4286_s1 + $0xf8] sm:$0xff]   ;;  %v3375_v55 = vld [vmem:[%s4286_s1 + $0x40] sm:$0xff]   ;;  %v3397_v19 = vld [vmem:[%s4286_s1 + $0xf0] sm:$0xff]  }
 0x140   :  { %v618_v53 = vpop.f32.mrf.mxu0  ;;  %v708_v42 = vadd.f32 %v3789_v14, %v688_v20  ;;  %v3374_v54 = vld [vmem:[%s4286_s1 + $0x38] sm:$0xff]   ;;  %v3376_v20 = vld [vmem:[%s4286_s1 + $0x48] sm:$0xff]   ;;  %v3377_v35 = vld [vmem:[%s4286_s1 + $0x50] sm:$0xff]  }
 0x141   :  { %v689_v56 = vmax.f32 %v4291_v28, %v673_v1  ;;  %v671_v8 = vmax.f32 %v3770_v30, %v618_v53  ;;  %v732_v10 = vpack.c.bf16 %v719_v41, %v718_v2  ;;  %v706_v21 = vadd.f32 %v3789_v14, %v686_v50  ;;  %v3378_v41 = vld [vmem:[%s4286_s1 + $0x58] sm:$0xff]   ;;  %v3379_v1 = vld [vmem:[%s4286_s1 + $0x60] sm:$0xff]   ;;  %v3380_v2 = vld [vmem:[%s4286_s1 + $0x68] sm:$0xff]  }
 0x142   :  { %v3025_v3 = vpop.f32.mrf.mxu0  ;;  %v724_v58 = vmax.f32 %v708_v42, 0.0  ;;  %v3381_v27 = vld [vmem:[%s4286_s1 + $0x70] sm:$0xff]   ;;  %v3382_v50 = vld [vmem:[%s4286_s1 + $0x78] sm:$0xff]   ;;  %v3383_v53 = vld [vmem:[%s4286_s1 + $0x80] sm:$0xff]  }
 0x143   :  { %v709_v29 = vadd.f32 %v3789_v14, %v689_v56  ;;  %v687_v43 = vmax.f32 %v4292_v18, %v671_v8  ;;  %v676_v5 = vmax.f32 %v3772_v31, %v3025_v3  ;;  %v722_v12 = vmax.f32 %v706_v21, 0.0  ;;  %v3387_v28 = vld [vmem:[%s4286_s1 + $0x90] sm:$0xff]   ;;  %v3388_v56 = vld [vmem:[%s4286_s1 + $0x98] sm:$0xff]   ;;  %v3400_v8 = vld [vmem:[%s4286_s1 + $0xa8] sm:$0xff]  }
 0x144   :  { %v631_v22 = vpop.f32.mrf.mxu0  ;;  %3111 = vmatprep.subr.bf16.mxu0 %v3400_v8  ;;  %v3401_v42 = vld [vmem:[%s4286_s1 + $0xa0] sm:$0xff]  }
 0x145   :  { %v725_v37 = vmax.f32 %v709_v29, 0.0  ;;  %v707_v44 = vadd.f32 %v3789_v14, %v687_v43  ;;  %v692_v30 = vmax.f32 %v4293_v7, %v676_v5  ;;  %v674_v57 = vmax.f32 %v3774_v32, %v631_v22  ;;  %3112 = vmatpush3.bf16.msra.mxu0 %v3400_v8  ;;  %v3402_v3 = vld [vmem:[%s4286_s1 + $0xe0] sm:$0xff]   ;;  %v3404_v29 = vld [vmem:[%s4286_s1 + $0x198] sm:$0xff]   ;;  %v3406_v7 = vld [vmem:[%s4286_s1 + $0x190] sm:$0xff]  }
 0x146   :  { %v3026_v4 = vpop.f32.mrf.mxu0  ;;  %3113 = vmatprep.subr.bf16.mxu0 %v3401_v42 }
 0x147   :  { %v723_v6 = vmax.f32 %v707_v44, 0.0  ;;  %v690_v9 = vmax.f32 %v4294_v45, %v674_v57  ;;  %v677_v31 = vmax.f32 %v3776_v33, %v3026_v4  ;;  %v735_v36 = vpack.c.bf16 %v725_v37, %v724_v58  ;;  %v3408_v58 = vld [vmem:[%s4286_s1 + $0x188] sm:$0xff]  }
 0x148   :  { %v634_v23 = vpop.f32.mrf.mxu0  ;;  %v712_v11 = vadd.f32 %v3789_v14, %v692_v30 }
 0x149   :  { %v693_v59 = vmax.f32 %v4295_v38, %v677_v31  ;;  %v675_v46 = vmax.f32 %v3778_v34, %v634_v23  ;;  %v734_v32 = vpack.c.bf16 %v723_v6, %v722_v12  ;;  %v710_v60 = vadd.f32 %v3789_v14, %v690_v9  ;;  %3114 = vmatpush3.bf16.msra.mxu0 %v3401_v42  ;;  %v3405_v9 = vld [vmem:[%s4286_s1 + $0x150] sm:$0xff]   ;;  %v3410_v31 = vld [vmem:[%s4286_s1 + $0x180] sm:$0xff]   ;;  %v3412_v38 = vld [vmem:[%s4286_s1 + $0x178] sm:$0xff]  }
 0x14a   :  { %v728_v39 = vmax.f32 %v712_v11, 0.0  ;;  %3139 = vmatprep.subr.bf16.mxu0 %v3404_v29  ;;  %v3425_v42 = vld [vmem:[%s4286_s1 + $0x1c0] sm:$0xff]  }
 0x14b   :  { %v691_v13 = vmax.f32 %v4296_v47, %v675_v46  ;;  %v713_v33 = vadd.f32 %v3789_v14, %v693_v59  ;;  %v726_v25 = vmax.f32 %v710_v60, 0.0  ;;  %v3414_v60 = vld [vmem:[%s4286_s1 + $0x170] sm:$0xff]  }
 0x14d   :  { %v711_v24 = vadd.f32 %v3789_v14, %v691_v13  ;;  %v729_v62 = vmax.f32 %v713_v33, 0.0  ;;  %v3370_v14 = vld [vmem:[%s4286_s1 + $0x18] sm:$0xff]  }
 0x14e   :  { %v3411_v33 = vld [vmem:[%s4286_s1 + $0x138] sm:$0xff]  }
 0x14f   :  { %v727_v48 = vmax.f32 %v711_v24, 0.0  ;;  %v737_v15 = vpack.c.bf16 %v729_v62, %v728_v39  ;;  %v3416_v24 = vld [vmem:[%s4286_s1 + $0x168] sm:$0xff]  }
 0x151   :  { %3027 = vmatprep.subr.bf16.mxu1 %v737_v15  ;;  %v736_v34 = vpack.c.bf16 %v727_v48, %v726_v25  ;;  %v3413_v48 = vld [vmem:[%s4286_s1 + $0x130] sm:$0xff]  }
 0x152   :  { %3028 = vmatpush3.bf16.msra.mxu1 %v737_v15  ;;  %v3418_v15 = vld [vmem:[%s4286_s1 + $0x160] sm:$0xff]  }
 0x153   :  { %3029 = vmatprep.subr.bf16.mxu1 %v736_v34 }
 0x156   :  { %3030 = vmatpush3.bf16.msra.mxu1 %v736_v34 }
 0x157   :  { %3031 = vmatprep.subr.bf16.mxu1 %v735_v36 }
 0x15a   :  { %3032 = vmatpush3.bf16.msra.mxu1 %v735_v36  ;;  %v3407_v36 = vld [vmem:[%s4286_s1 + $0x148] sm:$0xff]  }
 0x15b   :  { %3033 = vmatprep.subr.bf16.mxu1 %v734_v32 }
 0x15e   :  { %3034 = vmatpush3.bf16.msra.mxu1 %v734_v32  ;;  %v3409_v32 = vld [vmem:[%s4286_s1 + $0x140] sm:$0xff]  }
 0x15f   :  { %3035 = vmatprep.subr.bf16.mxu1 %v733_v16 }
 0x162   :  { %3036 = vmatpush3.bf16.msra.mxu1 %v733_v16  ;;  %v3384_v16 = vld [vmem:[%s4286_s1 + $0x88] sm:$0xff]  }
 0x163   :  { %3037 = vmatprep.subr.bf16.mxu1 %v732_v10 }
 0x166   :  { %3038 = vmatpush3.bf16.msra.mxu1 %v732_v10  ;;  %v3403_v10 = vld [vmem:[%s4286_s1 + $0x158] sm:$0xff]  }
 0x167   :  { %3039 = vmatprep.subr.bf16.mxu1 %v3813_v52 }
 0x16a   :  { %3040 = vmatpush3.bf16.msra.mxu1 %v3813_v52  ;;  %v3391_v52 = vld [vmem:[%s4286_s1 + $0x110] sm:$0xff]  }
 0x16b   :  { %3041 = vmatprep.subr.bf16.mxu1 %v3822_v61 }
 0x16e   :  { %3042 = vmatpush3.bf16.msra.mxu1 %v3822_v61  ;;  %v3372_v61 = vld [vmem:[%s4286_s1 + $0x28] sm:$0xff]  }
 0x16f   :  { %3079 = vmatprep.subr.bf16.mxu1 %v3389_v49 }
 0x171   :  { %3044 = vmatmul.mubr.bf16.vlgmr.msra.gmra.mxu1 %v3370_v14  ;;  %v3415_v14 = vld [vmem:[%s4286_s1 + $0x128] sm:$0xff]  }
 0x172   :  { %3047 = vmatprep.mubr.bf16.mxu1 %v3371_v17  ;;  %3080 = vmatpush3.bf16.msra.mxu1 %v3389_v49  ;;  %v3420_v17 = vld [vmem:[%s4286_s1 + $0x218] sm:$0xff]  }
 0x173   :  { %3081 = vmatprep.subr.bf16.mxu1 %v3391_v52 }
 0x176   :  { %3082 = vmatpush3.bf16.msra.mxu1 %v3391_v52 }
 0x177   :  { %3083 = vmatprep.subr.bf16.mxu1 %v3392_v40 }
 0x179   :  { %3048 = vmatmul.mubr.bf16.gmra.mxu1 %v3372_v61 }
 0x17a   :  { %3051 = vmatprep.mubr.bf16.mxu1 %v3373_v63  ;;  %3084 = vmatpush3.bf16.msra.mxu1 %v3392_v40  ;;  %v3417_v63 = vld [vmem:[%s4286_s1 + $0x120] sm:$0xff]  }
 0x17b   :  { %3085 = vmatprep.subr.bf16.mxu1 %v3394_v0 }
 0x17e   :  { %3086 = vmatpush3.bf16.msra.mxu1 %v3394_v0  ;;  %v3422_v0 = vld [vmem:[%s4286_s1 + $0x210] sm:$0xff]  }
 0x17f   :  { %3087 = vmatprep.subr.bf16.mxu1 %v3395_v26 }
 0x181   :  { %3052 = vmatmul.mubr.bf16.gmra.mxu1 %v3374_v54 }
 0x182   :  { %3055 = vmatprep.mubr.bf16.mxu1 %v3375_v55  ;;  %3088 = vmatpush3.bf16.msra.mxu1 %v3395_v26  ;;  %v3419_v55 = vld [vmem:[%s4286_s1 + $0x1d8] sm:$0xff]  }
 0x183   :  { %3089 = vmatprep.subr.bf16.mxu1 %v3397_v19 }
 0x186   :  { %3090 = vmatpush3.bf16.msra.mxu1 %v3397_v19  ;;  %v3424_v19 = vld [vmem:[%s4286_s1 + $0x208] sm:$0xff]  }
 0x187   :  { %3091 = vmatprep.subr.bf16.mxu1 %v3399_v51 }
 0x189   :  { %3056 = vmatmul.mubr.bf16.gmra.mxu1 %v3376_v20 }
 0x18a   :  { %3059 = vmatprep.mubr.bf16.mxu1 %v3377_v35  ;;  %3092 = vmatpush3.bf16.msra.mxu1 %v3399_v51 }
 0x18b   :  { %3093 = vmatprep.subr.bf16.mxu1 %v3402_v3 }
 0x18e   :  { %3094 = vmatpush3.bf16.msra.mxu1 %v3402_v3  ;;  %v3430_v3 = vld [vmem:[%s4286_s1 + $0x1f0] sm:$0xff]  }
 0x18f   :  { %3119 = vmatprep.subr.bf16.mxu1 %v3403_v10 }
 0x191   :  { %3060 = vmatmul.mubr.bf16.gmra.mxu1 %v3378_v41 }
 0x192   :  { %3063 = vmatprep.mubr.bf16.mxu1 %v3379_v1  ;;  %v3421_v1 = vld [vmem:[%s4286_s1 + $0x1d0] sm:$0xff]  }
 0x199   :  { %3064 = vmatmul.mubr.bf16.gmra.mxu1 %v3380_v2  ;;  %v3426_v2 = vld [vmem:[%s4286_s1 + $0x200] sm:$0xff]  }
 0x19a   :  { %3067 = vmatprep.mubr.bf16.mxu1 %v3381_v27 }
 0x1a1   :  { %3068 = vmatmul.mubr.bf16.gmra.mxu1 %v3382_v50 }
 0x1a2   :  { %3071 = vmatprep.mubr.bf16.mxu1 %v3383_v53 }
 0x1a9   :  { %3072 = vmatmul.mubr.bf16.gmra.mxu1 %v3384_v16  ;;  %v3423_v16 = vld [vmem:[%s4286_s1 + $0x1c8] sm:$0xff]  }
 0x1aa   :  { %3075 = vmatprep.mubr.bf16.mxu1 %v3387_v28  ;;  %v3428_v28 = vld [vmem:[%s4286_s1 + $0x1f8] sm:$0xff]  }
 0x1b1   :  { %3076 = vmatmul.mubr.bf16.gmra.mxu1 %v3388_v56 }
 0x231   :  { %v3045_v18 = vpop.f32.mrf.mxu1 }
 0x233   :  { %v916_v43 = vpop.f32.mrf.mxu1 }
 0x235   :  { %v3046_v5 = vpop.f32.mrf.mxu1 }
 0x236   :  { %v1060_v37 = vpack.c.bf16 %v3046_v5, %v3045_v18  ;;  %v3432_v18 = vld [vmem:[%s4286_s1 + $0x1e8] sm:$0xff]   ;;  %v3429_v5 = vld [vmem:[%s4286_s1 + $0x1b0] sm:$0xff]  }
 0x237   :  { %v919_v21 = vpop.f32.mrf.mxu1 }
 0x238   :  { %v1059_v22 = vpack.c.bf16 %v919_v21, %v916_v43  ;;  %v3434_v21 = vld [vmem:[%s4286_s1 + $0x1e0] sm:$0xff]  }
 0x239   :  { %v3049_v44 = vpop.f32.mrf.mxu1 }
 0x23a   :  { %3115 = vmatprep.mubr.bf16.mxu0 %v1059_v22 }
 0x23b   :  { %v932_v30 = vpop.f32.mrf.mxu1  ;;  %3116 = vmatmul.mubr.bf16.vlgmr.msra.gmra.mxu0 %v1060_v37  ;;  %v3431_v37 = vld [vmem:[%s4286_s1 + $0x1a8] sm:$0xff]  }
 0x23c   :  { %3140 = vmatpush3.bf16.msra.mxu0 %v3404_v29  ;;  %v3427_v29 = vld [vmem:[%s4286_s1 + $0x1b8] sm:$0xff]  }
 0x23d   :  { %v3050_v57 = vpop.f32.mrf.mxu1  ;;  %3141 = vmatprep.subr.bf16.mxu0 %v3406_v7 }
 0x23e   :  { %v1062_v45 = vpack.c.bf16 %v3050_v57, %v3049_v44  ;;  %v3436_v44 = vld [vmem:[%s4286_s1 + $0x298] sm:$0xff]   ;;  %v3433_v57 = vld [vmem:[%s4286_s1 + $0x1a0] sm:$0xff]  }
 0x23f   :  { %v935_v4 = vpop.f32.mrf.mxu1 }
 0x240   :  { %v1061_v6 = vpack.c.bf16 %v935_v4, %v932_v30  ;;  %3142 = vmatpush3.bf16.msra.mxu0 %v3406_v7 }
 0x241   :  { %3143 = vmatprep.subr.bf16.mxu0 %v3408_v58  ;;  %v3973_v12 = vpop.f32.mrf.mxu1 }
 0x242   :  { %3095 = vmatprep.mubr.bf16.mxu1 %v1061_v6  ;;  %v3435_v6 = vld [vmem:[%s4286_s1 + $0x258] sm:$0xff]  }
 0x243   :  { %3096 = vmatmul.mubr.bf16.vlgmr.msra.gmra.mxu1 %v1062_v45  ;;  %v948_v23 = vpop.f32.mrf.mxu1  ;;  %v3440_v45 = vld [vmem:[%s4286_s1 + $0x288] sm:$0xff]  }
 0x244   :  { %3120 = vmatpush3.bf16.msra.mxu1 %v3403_v10  ;;  %3144 = vmatpush3.bf16.msra.mxu0 %v3408_v58  ;;  %v3438_v58 = vld [vmem:[%s4286_s1 + $0x290] sm:$0xff]  }
 0x245   :  { %3121 = vmatprep.subr.bf16.mxu1 %v3405_v9  ;;  %3145 = vmatprep.subr.bf16.mxu0 %v3410_v31  ;;  %v3981_v59 = vpop.f32.mrf.mxu1 }
 0x246   :  { %v1064_v41 = vpack.c.bf16 %v3981_v59, %v3973_v12  ;;  %v3442_v12 = vld [vmem:[%s4286_s1 + $0x280] sm:$0xff]  }
 0x247   :  { %v951_v46 = vpop.f32.mrf.mxu1  ;;  %v3441_v59 = vld [vmem:[%s4286_s1 + $0x240] sm:$0xff]  }
 0x248   :  { %3122 = vmatpush3.bf16.msra.mxu1 %v3405_v9  ;;  %3146 = vmatpush3.bf16.msra.mxu0 %v3410_v31  ;;  %v1063_v11 = vpack.c.bf16 %v951_v46, %v948_v23  ;;  %v3437_v31 = vld [vmem:[%s4286_s1 + $0x250] sm:$0xff]  }
 0x249   :  { %3123 = vmatprep.subr.bf16.mxu1 %v3407_v36  ;;  %3147 = vmatprep.subr.bf16.mxu0 %v3412_v38  ;;  %v3057_v47 = vpop.f32.mrf.mxu1  ;;  %v3446_v46 = vld [vmem:[%s4286_s1 + $0x270] sm:$0xff]  }
 0x24a   :  { %3135 = vmatprep.mubr.bf16.mxu1 %v1063_v11  ;;  %v3443_v11 = vld [vmem:[%s4286_s1 + $0x238] sm:$0xff]  }
 0x24b   :  { %v964_v13 = vpop.f32.mrf.mxu1 }
 0x24c   :  { %3124 = vmatpush3.bf16.msra.mxu1 %v3407_v36  ;;  %3148 = vmatpush3.bf16.msra.mxu0 %v3412_v38  ;;  %v3439_v36 = vld [vmem:[%s4286_s1 + $0x248] sm:$0xff]   ;;  %v3444_v38 = vld [vmem:[%s4286_s1 + $0x278] sm:$0xff]  }
 0x24d   :  { %3125 = vmatprep.subr.bf16.mxu1 %v3409_v32  ;;  %3149 = vmatprep.subr.bf16.mxu0 %v3414_v60  ;;  %v3058_v39 = vpop.f32.mrf.mxu1 }
 0x24e   :  { %v1066_v40 = vpack.c.bf16 %v3058_v39, %v3057_v47  ;;  %v3450_v47 = vld [vmem:[%s4286_s1 + $0x260] sm:$0xff]  }
 0x24f   :  { %v967_v62 = vpop.f32.mrf.mxu1 }
 0x250   :  { %3126 = vmatpush3.bf16.msra.mxu1 %v3409_v32  ;;  %3150 = vmatpush3.bf16.msra.mxu0 %v3414_v60  ;;  %v1065_v25 = vpack.c.bf16 %v967_v62, %v964_v13  ;;  %v3448_v32 = vld [vmem:[%s4286_s1 + $0x268] sm:$0xff]   ;;  %v3445_v60 = vld [vmem:[%s4286_s1 + $0x230] sm:$0xff]   ;;  %v3449_v62 = vld [vmem:[%s4286_s1 + $0x220] sm:$0xff]  }
 0x251   :  { %3127 = vmatprep.subr.bf16.mxu1 %v3411_v33  ;;  %3151 = vmatprep.subr.bf16.mxu0 %v3416_v24  ;;  %v4001_v34 = vpop.f32.mrf.mxu1 }
 0x252   :  { %3155 = vmatprep.mubr.bf16.mxu0 %v1065_v25 }
 0x253   :  { %v980_v49 = vpop.f32.mrf.mxu1 }
 0x254   :  { %3128 = vmatpush3.bf16.msra.mxu1 %v3411_v33  ;;  %3152 = vmatpush3.bf16.msra.mxu0 %v3416_v24  ;;  %v3447_v33 = vld [vmem:[%s4286_s1 + $0x228] sm:$0xff]  }
 0x255   :  { %3129 = vmatprep.subr.bf16.mxu1 %v3413_v48  ;;  %3153 = vmatprep.subr.bf16.mxu0 %v3418_v15  ;;  %v4009_v52 = vpop.f32.mrf.mxu1 }
 0x256   :  { %v1068_v9 = vpack.c.bf16 %v4009_v52, %v4001_v34  ;;  %v3454_v52 = vld [vmem:[%s4286_s1 + $0x2c0] sm:$0xff]  }
 0x257   :  { %v983_v61 = vpop.f32.mrf.mxu1 }
 0x258   :  { %3130 = vmatpush3.bf16.msra.mxu1 %v3413_v48  ;;  %3154 = vmatpush3.bf16.msra.mxu0 %v3418_v15  ;;  %v1067_v50 = vpack.c.bf16 %v983_v61, %v980_v49  ;;  %v3451_v48 = vld [vmem:[%s4286_s1 + $0x2d8] sm:$0xff]   ;;  %v3456_v61 = vld [vmem:[%s4286_s1 + $0x2b0] sm:$0xff]  }
 0x259   :  { %3131 = vmatprep.subr.bf16.mxu1 %v3415_v14  ;;  %3179 = vmatprep.subr.bf16.mxu0 %v3420_v17  ;;  %v4017_v26 = vpop.f32.mrf.mxu1 }
 0x25b   :  { %3156 = vmatmul.mubr.bf16.vlgmr.msra.gmra.mxu0 %v1066_v40  ;;  %v996_v54 = vpop.f32.mrf.mxu1  ;;  %v3455_v40 = vld [vmem:[%s4286_s1 + $0x2b8] sm:$0xff]  }
 0x25c   :  { %3132 = vmatpush3.bf16.msra.mxu1 %v3415_v14  ;;  %3180 = vmatpush3.bf16.msra.mxu0 %v3420_v17  ;;  %v3452_v14 = vld [vmem:[%s4286_s1 + $0x2d0] sm:$0xff]   ;;  %v3453_v17 = vld [vmem:[%s4286_s1 + $0x2c8] sm:$0xff]  }
 0x25d   :  { %3133 = vmatprep.subr.bf16.mxu1 %v3417_v63  ;;  %3181 = vmatprep.subr.bf16.mxu0 %v3422_v0  ;;  %v3066_v51 = vpop.f32.mrf.mxu1 }
 0x25e   :  { %v1070_v7 = vpack.c.bf16 %v3066_v51, %v4017_v26  ;;  %v3461_v51 = vld [vmem:[%s4286_s1 + $0x310] sm:$0xff]  }
 0x25f   :  { %v999_v20 = vpop.f32.mrf.mxu1 }
 0x260   :  { %3134 = vmatpush3.bf16.msra.mxu1 %v3417_v63  ;;  %3182 = vmatpush3.bf16.msra.mxu0 %v3422_v0  ;;  %v1069_v35 = vpack.c.bf16 %v999_v20, %v996_v54  ;;  %v3457_v63 = vld [vmem:[%s4286_s1 + $0x2a8] sm:$0xff]   ;;  %v3458_v0 = vld [vmem:[%s4286_s1 + $0x2a0] sm:$0xff]   ;;  %v3459_v54 = vld [vmem:[%s4286_s1 + $0x318] sm:$0xff]  }
 0x261   :  { %3159 = vmatprep.subr.bf16.mxu1 %v3419_v55  ;;  %3183 = vmatprep.subr.bf16.mxu0 %v3424_v19  ;;  %v4033_v27 = vpop.f32.mrf.mxu1  ;;  %v3462_v20 = vld [vmem:[%s4286_s1 + $0x350] sm:$0xff]  }
 0x262   :  { %3195 = vmatprep.mubr.bf16.mxu0 %v1069_v35  ;;  %v3463_v35 = vld [vmem:[%s4286_s1 + $0x308] sm:$0xff]  }
 0x263   :  { %3136 = vmatmul.mubr.bf16.vlgmr.msra.gmra.mxu1 %v1064_v41  ;;  %v4035_v53 = vpop.f32.mrf.mxu1  ;;  %v3464_v41 = vld [vmem:[%s4286_s1 + $0x348] sm:$0xff]  }
 0x264   :  { %3160 = vmatpush3.bf16.msra.mxu1 %v3419_v55  ;;  %3184 = vmatpush3.bf16.msra.mxu0 %v3424_v19  ;;  %v3460_v55 = vld [vmem:[%s4286_s1 + $0x358] sm:$0xff]   ;;  %v3513_v19 = vmov 0.0  }
 0x265   :  { %3161 = vmatprep.subr.bf16.mxu1 %v3421_v1  ;;  %3185 = vmatprep.subr.bf16.mxu0 %v3426_v2  ;;  %v4043_v56 = vpop.f32.mrf.mxu1 }
 0x266   :  { %3175 = vmatprep.mubr.bf16.mxu1 %v1067_v50  ;;  %v1072_v49 = vpack.c.bf16 %v4043_v56, %v4033_v27  ;;  %v3467_v27 = vld [vmem:[%s4286_s1 + $0x2f8] sm:$0xff]   ;;  %v3472_v56 = vld [vmem:[%s4286_s1 + $0x328] sm:$0xff]  }
 0x267   :  { %v1015_v8 = vpop.f32.mrf.mxu1  ;;  %v3468_v50 = vld [vmem:[%s4286_s1 + $0x338] sm:$0xff]  }
 0x268   :  { %3162 = vmatpush3.bf16.msra.mxu1 %v3421_v1  ;;  %3186 = vmatpush3.bf16.msra.mxu0 %v3426_v2  ;;  %v1071_v23 = vpack.c.bf16 %v1015_v8, %v4035_v53  ;;  %v3465_v1 = vld [vmem:[%s4286_s1 + $0x300] sm:$0xff]   ;;  %v3469_v53 = vld [vmem:[%s4286_s1 + $0x2f0] sm:$0xff]  }
 0x269   :  { %3163 = vmatprep.subr.bf16.mxu1 %v3423_v16  ;;  %3187 = vmatprep.subr.bf16.mxu0 %v3428_v28  ;;  %v4051_v10 = vpop.f32.mrf.mxu1  ;;  %v3466_v2 = vld [vmem:[%s4286_s1 + $0x340] sm:$0xff]  }
 0x26a   :  { %v3473_v8 = vld [vmem:[%s4286_s1 + $0x2e0] sm:$0xff]  }
 0x26b   :  { %v1028_v43 = vpop.f32.mrf.mxu1 }
 0x26c   :  { %3164 = vmatpush3.bf16.msra.mxu1 %v3423_v16  ;;  %3188 = vmatpush3.bf16.msra.mxu0 %v3428_v28  ;;  %v3470_v16 = vld [vmem:[%s4286_s1 + $0x330] sm:$0xff]   ;;  %v3471_v28 = vld [vmem:[%s4286_s1 + $0x2e8] sm:$0xff]  }
 0x26d   :  { %3165 = vmatprep.subr.bf16.mxu1 %v3425_v42  ;;  %3189 = vmatprep.subr.bf16.mxu0 %v3430_v3  ;;  %v4065_v22 = vpop.f32.mrf.mxu1 }
 0x26e   :  { %v1074_v39 = vpack.c.bf16 %v4065_v22, %v4051_v10 }
 0x26f   :  { %v1031_v30 = vpop.f32.mrf.mxu1 }
 0x270   :  { %3166 = vmatpush3.bf16.msra.mxu1 %v3425_v42  ;;  %3190 = vmatpush3.bf16.msra.mxu0 %v3430_v3  ;;  %v1073_v4 = vpack.c.bf16 %v1031_v30, %v1028_v43  ;;  %v3474_v42 = vld [vmem:[%s4286_s1 + $0x320] sm:$0xff]  }
 0x271   :  { %3167 = vmatprep.subr.bf16.mxu1 %v3427_v29  ;;  %3191 = vmatprep.subr.bf16.mxu0 %v3432_v18  ;;  %v3077_v13 = vpop.f32.mrf.mxu1 }
 0x273   :  { %v1044_v24 = vpop.f32.mrf.mxu1 }
 0x274   :  { %3168 = vmatpush3.bf16.msra.mxu1 %v3427_v29  ;;  %3192 = vmatpush3.bf16.msra.mxu0 %v3432_v18 }
 0x275   :  { %3169 = vmatprep.subr.bf16.mxu1 %v3429_v5  ;;  %3193 = vmatprep.subr.bf16.mxu0 %v3434_v21  ;;  %v3078_v25 = vpop.f32.mrf.mxu1 }
 0x276   :  { %v1076_v26 = vpack.c.bf16 %v3078_v25, %v3077_v13 }
 0x277   :  { %v1047_v15 = vpop.f32.mrf.mxu1 }
 0x278   :  { %3170 = vmatpush3.bf16.msra.mxu1 %v3429_v5  ;;  %3194 = vmatpush3.bf16.msra.mxu0 %v3434_v21  ;;  %v1075_v34 = vpack.c.bf16 %v1047_v15, %v1044_v24 }
 0x279   :  { %3171 = vmatprep.subr.bf16.mxu1 %v3431_v37  ;;  %3219 = vmatprep.subr.bf16.mxu0 %v3436_v44 }
 0x27b   :  { %3196 = vmatmul.mubr.bf16.vlgmr.msra.gmra.mxu0 %v1070_v7 }
 0x27c   :  { %3172 = vmatpush3.bf16.msra.mxu1 %v3431_v37  ;;  %3220 = vmatpush3.bf16.msra.mxu0 %v3436_v44 }
 0x27d   :  { %3173 = vmatprep.subr.bf16.mxu1 %v3433_v57  ;;  %3221 = vmatprep.subr.bf16.mxu0 %v3438_v58 }
 0x27e   :  { %3235 = vmatprep.mubr.bf16.mxu0 %v1073_v4 }
 0x280   :  { %3174 = vmatpush3.bf16.msra.mxu1 %v3433_v57  ;;  %3222 = vmatpush3.bf16.msra.mxu0 %v3438_v58 }
 0x281   :  { %3199 = vmatprep.subr.bf16.mxu1 %v3435_v6  ;;  %3223 = vmatprep.subr.bf16.mxu0 %v3440_v45 }
 0x283   :  { %3176 = vmatmul.mubr.bf16.vlgmr.msra.gmra.mxu1 %v1068_v9 }
 0x284   :  { %3200 = vmatpush3.bf16.msra.mxu1 %v3435_v6  ;;  %3224 = vmatpush3.bf16.msra.mxu0 %v3440_v45 }
 0x285   :  { %3201 = vmatprep.subr.bf16.mxu1 %v3437_v31  ;;  %3225 = vmatprep.subr.bf16.mxu0 %v3442_v12 }
 0x286   :  { %3215 = vmatprep.mubr.bf16.mxu1 %v1071_v23 }
 0x288   :  { %3202 = vmatpush3.bf16.msra.mxu1 %v3437_v31  ;;  %3226 = vmatpush3.bf16.msra.mxu0 %v3442_v12 }
 0x289   :  { %3203 = vmatprep.subr.bf16.mxu1 %v3439_v36  ;;  %3227 = vmatprep.subr.bf16.mxu0 %v3444_v38 }
 0x28c   :  { %3204 = vmatpush3.bf16.msra.mxu1 %v3439_v36  ;;  %3228 = vmatpush3.bf16.msra.mxu0 %v3444_v38 }
 0x28d   :  { %3205 = vmatprep.subr.bf16.mxu1 %v3441_v59  ;;  %3229 = vmatprep.subr.bf16.mxu0 %v3446_v46 }
 0x290   :  { %3206 = vmatpush3.bf16.msra.mxu1 %v3441_v59  ;;  %3230 = vmatpush3.bf16.msra.mxu0 %v3446_v46 }
 0x291   :  { %3207 = vmatprep.subr.bf16.mxu1 %v3443_v11  ;;  %3231 = vmatprep.subr.bf16.mxu0 %v3448_v32 }
 0x294   :  { %3208 = vmatpush3.bf16.msra.mxu1 %v3443_v11  ;;  %3232 = vmatpush3.bf16.msra.mxu0 %v3448_v32 }
 0x295   :  { %3209 = vmatprep.subr.bf16.mxu1 %v3445_v60  ;;  %3233 = vmatprep.subr.bf16.mxu0 %v3450_v47 }
 0x298   :  { %3210 = vmatpush3.bf16.msra.mxu1 %v3445_v60  ;;  %3234 = vmatpush3.bf16.msra.mxu0 %v3450_v47 }
 0x299   :  { %3211 = vmatprep.subr.bf16.mxu1 %v3447_v33  ;;  %3259 = vmatprep.subr.bf16.mxu0 %v3513_v19 }
 0x29b   :  { %3236 = vmatmul.mubr.bf16.vlgmr.msra.gmra.mxu0 %v1074_v39 }
 0x29c   :  { %3212 = vmatpush3.bf16.msra.mxu1 %v3447_v33  ;;  %3260 = vmatpush3.bf16.msra.mxu0 %v3459_v54 }
 0x29d   :  { %3213 = vmatprep.subr.bf16.mxu1 %v3449_v62  ;;  %3261 = vmatprep.subr.bf16.mxu0 %v3513_v19 }
 0x29e   :  { %3275 = vmatprep.mubr.msk.bf16.mxu0 %vm3514_vm1, %v3513_v19 }
 0x2a0   :  { %3214 = vmatpush3.bf16.msra.mxu1 %v3449_v62  ;;  %3262 = vmatpush3.bf16.msra.mxu0 %v3461_v51 }
 0x2a1   :  { %3239 = vmatprep.subr.bf16.mxu1 %v3451_v48  ;;  %3263 = vmatprep.subr.bf16.mxu0 %v3513_v19 }
 0x2a3   :  { %3216 = vmatmul.mubr.bf16.vlgmr.msra.gmra.mxu1 %v1072_v49 }
 0x2a4   :  { %3240 = vmatpush3.bf16.msra.mxu1 %v3451_v48  ;;  %3255 = vmatprep.mubr.bf16.mxu1 %v1075_v34 }
 0x2a5   :  { %3241 = vmatprep.subr.bf16.mxu1 %v3452_v14  ;;  %3264 = vmatpush3.bf16.msra.mxu0 %v3463_v35 }
 0x2a6   :  { %3265 = vmatprep.subr.bf16.mxu0 %v3513_v19 }
 0x2a8   :  { %3242 = vmatpush3.bf16.msra.mxu1 %v3452_v14 }
 0x2a9   :  { %3243 = vmatprep.subr.bf16.mxu1 %v3453_v17  ;;  %3266 = vmatpush3.bf16.msra.mxu0 %v3465_v1 }
 0x2aa   :  { %3267 = vmatprep.subr.bf16.mxu0 %v3513_v19 }
 0x2ac   :  { %3244 = vmatpush3.bf16.msra.mxu1 %v3453_v17 }
 0x2ad   :  { %3245 = vmatprep.subr.bf16.mxu1 %v3454_v52  ;;  %3268 = vmatpush3.bf16.msra.mxu0 %v3467_v27 }
 0x2ae   :  { %3269 = vmatprep.subr.bf16.mxu0 %v3513_v19 }
 0x2b0   :  { %3246 = vmatpush3.bf16.msra.mxu1 %v3454_v52 }
 0x2b1   :  { %3247 = vmatprep.subr.bf16.mxu1 %v3455_v40  ;;  %3270 = vmatpush3.bf16.msra.mxu0 %v3469_v53 }
 0x2b2   :  { %3271 = vmatprep.subr.bf16.mxu0 %v3513_v19 }
 0x2b4   :  { %3248 = vmatpush3.bf16.msra.mxu1 %v3455_v40 }
 0x2b5   :  { %3249 = vmatprep.subr.bf16.mxu1 %v3456_v61  ;;  %3272 = vmatpush3.bf16.msra.mxu0 %v3471_v28 }
 0x2b6   :  { %3273 = vmatprep.subr.bf16.mxu0 %v3513_v19 }
 0x2b8   :  { %3250 = vmatpush3.bf16.msra.mxu1 %v3456_v61 }
 0x2b9   :  { %3251 = vmatprep.subr.bf16.mxu1 %v3457_v63  ;;  %3274 = vmatpush3.bf16.msra.mxu0 %v3473_v8 }
 0x2ba   :  { %3299 = vmatprep.subr.bf16.mxu0 %v3513_v19 }
 0x2bc   :  { %3252 = vmatpush3.bf16.msra.mxu1 %v3457_v63 }
 0x2bd   :  { %3253 = vmatprep.subr.bf16.mxu1 %v3458_v0 }
 0x2c0   :  { %3254 = vmatpush3.bf16.msra.mxu1 %v3458_v0 }
 0x2c1   :  { %3279 = vmatprep.subr.bf16.mxu1 %v3513_v19 }
 0x2c3   :  { %3256 = vmatmul.mubr.bf16.vlgmr.msra.gmra.mxu1 %v1076_v26 }
 0x2c4   :  { %3280 = vmatpush3.bf16.msra.mxu1 %v3460_v55  ;;  %3295 = vmatprep.mubr.msk.bf16.mxu1 %vm3514_vm1, %v3513_v19 }
 0x2c5   :  { %3281 = vmatprep.subr.bf16.mxu1 %v3513_v19 }
 0x2c8   :  { %3282 = vmatpush3.bf16.msra.mxu1 %v3462_v20 }
 0x2c9   :  { %3283 = vmatprep.subr.bf16.mxu1 %v3513_v19 }
 0x2cc   :  { %3284 = vmatpush3.bf16.msra.mxu1 %v3464_v41 }
 0x2cd   :  { %3285 = vmatprep.subr.bf16.mxu1 %v3513_v19 }
 0x2d0   :  { %3286 = vmatpush3.bf16.msra.mxu1 %v3466_v2 }
 0x2d1   :  { %3287 = vmatprep.subr.bf16.mxu1 %v3513_v19 }
 0x2d4   :  { %3288 = vmatpush3.bf16.msra.mxu1 %v3468_v50 }
 0x2d5   :  { %3289 = vmatprep.subr.bf16.mxu1 %v3513_v19 }
 0x2d8   :  { %3290 = vmatpush3.bf16.msra.mxu1 %v3470_v16 }
 0x2d9   :  { %3291 = vmatprep.subr.bf16.mxu1 %v3513_v19 }
 0x2dc   :  { %3292 = vmatpush3.bf16.msra.mxu1 %v3472_v56 }
 0x2dd   :  { %3293 = vmatprep.subr.bf16.mxu1 %v3513_v19 }
 0x2e0   :  { %3294 = vmatpush3.bf16.msra.mxu1 %v3474_v42 }
 0x2e1   :  { %3319 = vmatprep.subr.bf16.mxu1 %v3513_v19 }
 0x2fb   :  { %v3117_v10 = vpop.f32.mrf.mxu0 }
 0x2fd   :  { %v1288_v18 = vpop.f32.mrf.mxu0 }
 0x2ff   :  { %v3118_v5 = vpop.f32.mrf.mxu0 }
 0x301   :  { %v1291_v37 = vpop.f32.mrf.mxu0 }
 0x303   :  { %v3097_v3 = vpop.f32.mrf.mxu1 }
 0x304   :  { %v1297_v59 = vadd.f32 %v3117_v10, %v3097_v3 }
 0x305   :  { %v1191_v29 = vpop.f32.mrf.mxu1 }
 0x306   :  { %v1289_v46 = vadd.f32 %v1288_v18, %v1191_v29  ;;  %v2745_v18 = vld [vmem:[%s4287_s2 + $0x1] ss:$0 sm:$0xff] }
 0x307   :  { %v3098_v43 = vpop.f32.mrf.mxu1 }
 0x308   :  { %v1300_v11 = vadd.f32 %v3118_v5, %v3098_v43 }
 0x309   :  { %v1194_v21 = vpop.f32.mrf.mxu1 }
 0x30a   :  { %v1292_v60 = vadd.f32 %v1291_v37, %v1194_v21 }
 0x31b   :  { %v3157_v7 = vpop.f32.mrf.mxu0 }
 0x31d   :  { %v1518_v57 = vpop.f32.mrf.mxu0 }
 0x31f   :  { %v3158_v4 = vpop.f32.mrf.mxu0 }
 0x321   :  { %v1521_v45 = vpop.f32.mrf.mxu0 }
 0x323   :  { %v3137_v22 = vpop.f32.mrf.mxu1 }
 0x324   :  { %v1418_v47 = vadd.f32 %v3137_v22, %v1297_v59 }
 0x325   :  { %v1401_v44 = vpop.f32.mrf.mxu1 }
 0x326   :  { %v1416_v13 = vadd.f32 %v1401_v44, %v1289_v46  ;;  %v1535_v48 = vadd.f32 %v3157_v7, %v1418_v47 }
 0x327   :  { %v3138_v30 = vpop.f32.mrf.mxu1 }
 0x328   :  { %v1419_v33 = vadd.f32 %v3138_v30, %v1300_v11  ;;  %v1533_v15 = vadd.f32 %v1518_v57, %v1416_v13 }
 0x329   :  { %v1404_v58 = vpop.f32.mrf.mxu1 }
 0x32a   :  { %v1417_v39 = vadd.f32 %v1404_v58, %v1292_v60  ;;  %v1536_v34 = vadd.f32 %v3158_v4, %v1419_v33  ;;  %v3475_v4 = vld [vmem:[%s4286_s1 + $0x398] sm:$0xff]  }
 0x32c   :  { %v1534_v49 = vadd.f32 %v1521_v45, %v1417_v39  ;;  %v3476_v45 = vld [vmem:[%s4286_s1 + $0x390] sm:$0xff]  }
 0x32d   :  { %v3484_v39 = vld [vmem:[%s4286_s1 + $0x3b0] sm:$0xff]  }
 0x33b   :  { %v3197_v31 = vpop.f32.mrf.mxu0 }
 0x33d   :  { %v1752_v23 = vpop.f32.mrf.mxu0 }
 0x33f   :  { %v3198_v38 = vpop.f32.mrf.mxu0 }
 0x341   :  { %v1755_v24 = vpop.f32.mrf.mxu0 }
 0x343   :  { %v3177_v6 = vpop.f32.mrf.mxu1 }
 0x344   :  { %v1652_v14 = vadd.f32 %v3177_v6, %v1535_v48 }
 0x345   :  { %v1635_v9 = vpop.f32.mrf.mxu1 }
 0x346   :  { %v1650_v17 = vadd.f32 %v1635_v9, %v1533_v15  ;;  %v1769_v0 = vadd.f32 %v3197_v31, %v1652_v14  ;;  %v3477_v9 = vld [vmem:[%s4286_s1 + $0x388] sm:$0xff]   ;;  %v3478_v31 = vld [vmem:[%s4286_s1 + $0x380] sm:$0xff]  }
 0x347   :  { %v3178_v12 = vpop.f32.mrf.mxu1  ;;  %v3485_v14 = vld [vmem:[%s4286_s1 + $0x3a8] sm:$0xff]  }
 0x348   :  { %v1653_v52 = vadd.f32 %v3178_v12, %v1536_v34  ;;  %v1767_v26 = vadd.f32 %v1752_v23, %v1650_v17  ;;  %v3479_v12 = vld [vmem:[%s4286_s1 + $0x378] sm:$0xff]   ;;  %v3480_v23 = vld [vmem:[%s4286_s1 + $0x370] sm:$0xff]   ;;  %v3486_v17 = vld [vmem:[%s4286_s1 + $0x3a0] sm:$0xff]  }
 0x349   :  { %v1638_v36 = vpop.f32.mrf.mxu1 }
 0x34a   :  { %v1651_v63 = vadd.f32 %v1638_v36, %v1534_v49  ;;  %v1770_v54 = vadd.f32 %v3198_v38, %v1653_v52  ;;  %v3481_v36 = vld [vmem:[%s4286_s1 + $0x368] sm:$0xff]   ;;  %v3482_v38 = vld [vmem:[%s4286_s1 + $0x360] sm:$0xff]  }
 0x34c   :  { %v1768_v20 = vadd.f32 %v1755_v24, %v1651_v63  ;;  %v3483_v24 = vld [vmem:[%s4286_s1 + $0x3b8] sm:$0xff]  }
 0x35b   :  { %v3237_v25 = vpop.f32.mrf.mxu0 }
 0x35d   :  { %v1986_v61 = vpop.f32.mrf.mxu0 }
 0x35f   :  { %v3238_v51 = vpop.f32.mrf.mxu0 }
 0x361   :  { %v1989_v50 = vpop.f32.mrf.mxu0 }
 0x363   :  { %v3217_v32 = vpop.f32.mrf.mxu1 }
 0x364   :  { %v1886_v35 = vadd.f32 %v3217_v32, %v1769_v0 }
 0x365   :  { %v1869_v62 = vpop.f32.mrf.mxu1 }
 0x366   :  { %v1884_v41 = vadd.f32 %v1869_v62, %v1767_v26  ;;  %v2003_v16 = vadd.f32 %v3237_v25, %v1886_v35 }
 0x367   :  { %v3218_v40 = vpop.f32.mrf.mxu1 }
 0x368   :  { %v1887_v1 = vadd.f32 %v3218_v40, %v1770_v54  ;;  %v2001_v28 = vadd.f32 %v1986_v61, %v1884_v41 }
 0x369   :  { %v1872_v55 = vpop.f32.mrf.mxu1 }
 0x36a   :  { %v1885_v27 = vadd.f32 %v1872_v55, %v1768_v20  ;;  %v2004_v56 = vadd.f32 %v3238_v51, %v1887_v1 }
 0x36c   :  { %v2002_v42 = vadd.f32 %v1989_v50, %v1885_v27  ;;  %v2771_v27 = vld [vmem:[%s4287_s2 + $0x3] ss:$0 sm:$0xff] }
 0x383   :  { %v3257_v2 = vpop.f32.mrf.mxu1 }
 0x384   :  { %v2120_v3 = vadd.f32 %v3257_v2, %v2003_v16 }
 0x385   :  { %v2103_v53 = vpop.f32.mrf.mxu1 }
 0x386   :  { %v2118_v10 = vadd.f32 %v2103_v53, %v2001_v28  ;;  %v2128_v22 = vadd.f32 %v2745_v18, %v2120_v3 }
 0x387   :  { %v3258_v8 = vpop.f32.mrf.mxu1 }
 0x388   :  { %v2121_v29 = vadd.f32 %v3258_v8, %v2004_v56  ;;  %v2126_v37 = vadd.f32 %v2745_v18, %v2118_v10 }
 0x389   :  { %v2106_v43 = vpop.f32.mrf.mxu1 }
 0x38a   :  { %v2129_v5 = vadd.f32 %v2745_v18, %v2121_v29  ;;  %v2119_v21 = vadd.f32 %v2106_v43, %v2002_v42 }
 0x38c   :  { %v2127_v44 = vadd.f32 %v2745_v18, %v2119_v21  ;;  %v2131_v7 = vmax.f32 %v2128_v22, %v2129_v5 }
 0x38e   :  { %v2130_v30 = vmax.f32 %v2126_v37, %v2127_v44 }
 0x390   :  { %v2132_v57 = vmax.f32 %v2130_v30, %v2131_v7 }
 0x392   :  { %v2133_v58 = vmax.f32 %v2132_v57, 0.0 }
 0x394   :  { %v2134_v6 = vpack.c.bf16 %v2133_v58, %v2133_v58 }
 0x396   :  { %3276 = vmatmul.mubr.bf16.vlgmr.msra.gmra.mxu0 %v2134_v6  ;;  %3296 = vmatmul.mubr.bf16.vlgmr.msra.gmra.mxu1 %v2134_v6 }
 0x397   :  { %3300 = vmatpush3.bf16.msra.mxu0 %v3475_v4  ;;  %3315 = vmatprep.mubr.msk.bf16.mxu0 %vm3514_vm1, %v3513_v19 }
 0x398   :  { %3301 = vmatprep.subr.bf16.mxu0 %v3513_v19  ;;  %3327 = vmatprep.mubr.msk.bf16.mxu1 %vm3514_vm1, %v3513_v19 }
 0x399   :  { %3320 = vmatpush3.bf16.msra.mxu1 %v3483_v24 }
 0x39a   :  { %3321 = vmatprep.subr.bf16.mxu1 %v3513_v19 }
 0x39b   :  { %3302 = vmatpush3.bf16.msra.mxu0 %v3476_v45 }
 0x39c   :  { %3303 = vmatprep.subr.bf16.mxu0 %v3513_v19 }
 0x39d   :  { %3322 = vmatpush3.bf16.msra.mxu1 %v3484_v39 }
 0x39e   :  { %3323 = vmatprep.subr.bf16.mxu1 %v3513_v19 }
 0x39f   :  { %3304 = vmatpush3.bf16.msra.mxu0 %v3477_v9 }
 0x3a0   :  { %3305 = vmatprep.subr.bf16.mxu0 %v3513_v19 }
 0x3a1   :  { %3324 = vmatpush3.bf16.msra.mxu1 %v3485_v14 }
 0x3a2   :  { %3325 = vmatprep.subr.bf16.mxu1 %v3513_v19 }
 0x3a3   :  { %3306 = vmatpush3.bf16.msra.mxu0 %v3478_v31 }
 0x3a4   :  { %3307 = vmatprep.subr.bf16.mxu0 %v3513_v19 }
 0x3a5   :  { %3326 = vmatpush3.bf16.msra.mxu1 %v3486_v17 }
 0x3a7   :  { %3308 = vmatpush3.bf16.msra.mxu0 %v3479_v12 }
 0x3a8   :  { %3309 = vmatprep.subr.bf16.mxu0 %v3513_v19 }
 0x3ab   :  { %3310 = vmatpush3.bf16.msra.mxu0 %v3480_v23 }
 0x3ac   :  { %3311 = vmatprep.subr.bf16.mxu0 %v3513_v19 }
 0x3af   :  { %3312 = vmatpush3.bf16.msra.mxu0 %v3481_v36 }
 0x3b0   :  { %3313 = vmatprep.subr.bf16.mxu0 %v3513_v19  ;;  %v2770_v19 = vld [vmem:[%s4287_s2 + $0x2] ss:$0 sm:$0xff]  ;;  %s2580_s2 = sshll.u32 %s3516_s18, 4  ;;  %s2581_s2 = int_to_ptr.vmem [resolvable:$true] %s2580_s2 }
 0x3b1   :  { %s3491_s19 = scalar_lea.vmem %s2581_s2, 32  ;;  %p3496_p1 = scmp.lt.s32.totalorder %s2581_s2, %s2581_s2 }
 0x3b2   :  { %p3492_p0 = scmp.ne.s32.totalorder %s2581_s2, %s3491_s19  ;;  %p3497_p2 = scmp.lt.s32.totalorder %s3491_s19, %s3491_s19 }
 0x3b3   :  { %3314 = vmatpush3.bf16.msra.mxu0 %v3482_v38 }
 0x3b4   :  { %p3498_p3 = por %p3497_p2, %p3496_p1 }
 0x3b6   :  { %3316 = vmatmul.mubr.bf16.vlgmr.msra.gmra.mxu0 %v2134_v6  ;;  %p3499_p4 = pnand %p3498_p3, %p3492_p0 }
 0x456   :  { %v2233_v59 = vpop.f32.mrf.mxu0  ;;  %v2337_v46 = vpop.f32.mrf.mxu1 }
 0x457   :  { %v2448_v34 = vrot.slane %v2233_v59, 1  ;;  %v2454_v55 = vrot.slane %v2337_v46, 2 }
 0x458   :  { %v3277_v11 = vpop.f32.mrf.mxu0  ;;  %v3297_v32 = vpop.f32.mrf.mxu1 }
 0x45a   :  { %v2236_v60 = vpop.f32.mrf.mxu0  ;;  %v2340_v47 = vpop.f32.mrf.mxu1 }
 0x45c   :  { %v3278_v13 = vpop.f32.mrf.mxu0  ;;  %v3298_v33 = vpop.f32.mrf.mxu1 }
 0x476   :  { %v2441_v62 = vpop.f32.mrf.mxu0 }
 0x477   :  { %v2458_v25 = vrot.slane %v2441_v62, 1  ;;  %v2463_v40 = vrot.slane %v2441_v62, 2 }
 0x478   :  { %v3317_v48 = vpop.f32.mrf.mxu0 }
 0x479   :  { %2459 = vrot.lane.b32.xlu0 %v2458_v25, %s3515_s10 }
 0x47a   :  { %v2444_v15 = vpop.f32.mrf.mxu0 }
 0x47c   :  { %v3318_v49 = vpop.f32.mrf.mxu0 }
 0x47d   :  { %2449 = vrot.lane.b32.xlu0 %v2448_v34, %s3515_s10 }
 0x4eb   :  { %v2460_v52 = vpop.permute.xlu0 %2459 }
 0x4ec   :  { %v2462_v61 = vadd.f32 %v2460_v52, %v2337_v46 }
 0x4ee   :  { %v2465_v63 = vadd.f32 %v2463_v40, %v2462_v61 }
 0x4ef   :  { %v2450_v26 = vpop.permute.xlu0 %2449 }
 0x4f0   :  { %v2467_v0 = vrot.slane %v2465_v63, 1  ;;  %v2452_v54 = vadd.f32 %v2450_v26, %v2233_v59 }
 0x4f2   :  { %2468 = vrot.lane.b32.xlu1 %v2467_v0, %s3515_s10  ;;  %v2456_v51 = vadd.f32 %v2454_v55, %v2452_v54 }
 0x564   :  { %v2469_v20 = vpop.permute.xlu1 %2468 }
 0x565   :  { %v2472_v35 = vsel %vm2471_vm2, %v2456_v51, %v2469_v20 }
 0x566   :  { %v2477_v41 = vadd.f32 %v2770_v19, %v2472_v35 }
 0x568   :  { %v2478_v1 = vmax.f32 %v2477_v41, 0.0 }
 0x56a   :  { %v2487_v2 = vpack.c.bf16 %v2478_v1, %v2478_v1 }
 0x56c   :  { %3328 = vmatmul.mubr.msk.bf16.vlgmr.msra.gmra.mxu1 %vm2516_vm3, %v2487_v2 }
 0x62c   :  { %v2554_v50 = vpop.f32.mrf.mxu1 }
 0x62d   :  { %v2555_v53 = vadd.f32 %v2771_v27, %v2554_v50 }
 0x62e   :  { %v3329_v16 = vpop.f32.mrf.mxu1 }
 0x62f   :  { %v2561_v28 = vsel %vm2560_vm4, %v2555_v53, -inf }
 0x630   :  { %2562 = vmax.xlane.f32.xlu1 %v2561_v28  ;;  %v2557_v56 = vpop.f32.mrf.mxu1 }
 0x632   :  { %v3330_v8 = vpop.f32.mrf.mxu1 }
 0x6b9   :  { %v2563_v42 = vpop.xlane.xlu1 %2562 }
 0x6ba   :  { %v2564_v3 = vsub.f32 %v2555_v53, %v2563_v42 }
 0x6bc   :  { %v2565_v10 = vmul.f32 1.442695, %v2564_v3 }
 0x6be   :  { %3487 = vpow2.f32 %v2565_v10 }
 0x6cb   :  { %v3488_v29 = vpop.eup %3487 }
 0x6cc   :  { %v2567_v18 = vsel %vm2560_vm4, %v3488_v29, 0.0 }
 0x6cd   :  { %2568 = vadd.xlane.f32.xlu0 %v2567_v18 }
 0x756   :  { %v2569_v43 = vpop.xlane.xlu0 %2568 }
 0x757   :  { %3489 = vlog2.f32 %v2569_v43 }
 0x764   :  { %v3490_v5 = vpop.eup %3489 }
 0x765   :  { %v2571_v21 = vmul.f32 0.6931472, %v3490_v5 }
 0x767   :  { %v2572_v22 = vsub.f32 %v2564_v3, %v2571_v21 }
 0x769   :  { %2573 = vst [vmem:[#allocation2] sm:$0x3] %v2572_v22 }
 0x76a   :  { %3502 = shalt.err (!%p3499_p4)
}
 0x76b   :  { %2583 = dma.vmem_to_hbm [thread:$0]  %s2581_s2, 32, %s4288_s3, [#allocation3]  }
 0x76c   :  { %3511 = dma.done.wait [#allocation3], 32  }
 0x76d   :  { %3512 = vsyncadd [#allocation3], 4294967264 }
 0x76e   :  { %2587 = vsyncpa [#allocation3], 1 }

</bundles_post_ra>
